<compile_context>
chip_gen: v6e
topology: v6e:2x2x1
jax: 0.10.0
libtpu: 0.0.40
codegen_flags: <defaults>
</compile_context>

<pallas_src>
import functools

import jax
import jax.numpy as jnp
from jax.experimental import pallas as pl
from jax.experimental.pallas import tpu as pltpu

BN_EPS = 1e-5


def _vmem_limit_bytes():
    """~48 MiB on v7x (64 MiB physical VMEM), ~96 MiB on v5e/v6e (128 MiB); 32 MiB fallback."""
    try:
        cap = int(pltpu.get_tpu_info().vmem_capacity_bytes)
        return max(min(cap - 16 * 1024 * 1024, 96 * 1024 * 1024), 16 * 1024 * 1024)
    except Exception:
        return 32 * 1024 * 1024


VMEM_LIMIT = _vmem_limit_bytes()


# -------------- Pass A: conv (in-kernel im2col via row-shifted matmuls) + BN partials --------------

def _conv_stats_kernel(x_ref, w_ref, y_ref, sum_ref, ssq_ref, *, kh, hout, stride):
    """One batch image.

    x_ref : (Hp, Wp*Cin) bf16   lane-packed, spatially padded input rows
    w_ref : (KH, Wp*Cin, Wout*Cout) bf16   per-row-tap Toeplitz weights
    y_ref : (Hout, Wout*Cout) bf16   raw conv output (bias dropped; cancels under BN)
    sum_ref/ssq_ref : (1, Wout*Cout) f32   per-image BN partial statistics
    """
    def tap(d):
        if stride == 1:
            return x_ref[pl.ds(d, hout), :]
        return x_ref[pl.ds(d, hout, stride), :]

    acc = jnp.dot(tap(0), w_ref[0], preferred_element_type=jnp.float32)
    for d in range(1, kh):
        acc = acc + jnp.dot(tap(d), w_ref[d], preferred_element_type=jnp.float32)

    y_ref[...] = acc.astype(y_ref.dtype)                       # bf16 store (half HBM traffic)
    sum_ref[...] = jnp.sum(acc, axis=0, keepdims=True)         # f32 partial stats (no race:
    ssq_ref[...] = jnp.sum(acc * acc, axis=0, keepdims=True)   # one partial row per grid step)


def _toeplitz_weights(w_oihw, wout, wp, stride):
    """OIHW conv weight -> per-row-tap lane-Toeplitz matmul weights.

    Returns B (KH, Wp*Cin, Wout*Cout) bf16 such that, for lane-packed padded rows Xp,
        Y[ho, wo*Cout+co] = sum_d Xp[ho*stride + d, :] @ B[d]
    reproduces Conv2d.  Only this small weight matrix carries the zero blocks; the
    activations are never expanded (no wrapper-side im2col)."""
    cout, cin, kh, kw = w_oihw.shape
    k = jnp.arange(wp * cin)
    wo = jnp.arange(wout)
    dj = jnp.arange(kw)
    ci = jnp.arange(cin)
    tgt = (wo[:, None, None] * stride + dj[None, :, None]) * cin + ci[None, None, :]
    onehot = (k[:, None, None, None] == tgt[None, :, :, :]).astype(jnp.float32)
    w_t = jnp.transpose(w_oihw, (2, 3, 1, 0)).astype(jnp.float32)       # (KH, KW, Cin, Cout)
    b = jnp.einsum("kwjc,djco->dkwo", onehot, w_t)                      # (KH, WpCin, Wout, Cout)
    return b.reshape(kh, wp * cin, wout * cout).astype(jnp.bfloat16)


def _conv_bn_stats(x_packed, w_oihw, gamma, beta, stride, padding):
    """Conv2d (bias dropped - a constant bias cancels under train-mode BN) + batch stats.

    x_packed : (N, H, W*Cin) bf16, lane-packed NHWC, unpadded.
    Returns y (N, Hout, Wout*Cout) bf16 and packed-lane affine (a, b) with
    bn(conv(x)) == y * a + b, plus (hout, wout)."""
    n, h, wc = x_packed.shape
    cout, cin, kh, kw = w_oihw.shape
    w_sp = wc // cin
    hout = (h + 2 * padding - kh) // stride + 1
    wout = (w_sp + 2 * padding - kw) // stride + 1
    ldim = wout * cout

    if padding:
        # Spatial padding in the packed layout: W-pad == Cin lanes per side.
        x_packed = jnp.pad(x_packed, ((0, 0), (padding, padding),
                                      (padding * cin, padding * cin)))
    hp = h + 2 * padding
    wp = w_sp + 2 * padding

    w_toe = _toeplitz_weights(w_oihw, wout, wp, stride)

    kern = functools.partial(_conv_stats_kernel, kh=kh, hout=hout, stride=stride)
    y, s, ss = pl.pallas_call(
        kern,
        out_shape=(jax.ShapeDtypeStruct((n, hout, ldim), jnp.bfloat16),
                   jax.ShapeDtypeStruct((n, 1, ldim), jnp.float32),
                   jax.ShapeDtypeStruct((n, 1, ldim), jnp.float32)),
        grid=(n,),
        in_specs=[pl.BlockSpec((None, hp, wp * cin), lambda i: (i, 0, 0)),
                  pl.BlockSpec((kh, wp * cin, ldim), lambda i: (0, 0, 0))],
        out_specs=(pl.BlockSpec((None, hout, ldim), lambda i: (i, 0, 0)),
                   pl.BlockSpec((None, 1, ldim), lambda i: (i, 0, 0)),
                   pl.BlockSpec((None, 1, ldim), lambda i: (i, 0, 0))),
        compiler_params=pltpu.CompilerParams(
            dimension_semantics=("parallel",),      # per-image partials -> safe on 2-TC v7x
            vmem_limit_bytes=VMEM_LIMIT),
    )(x_packed, w_toe)

    # Reduce tiny per-image / per-(wo) partials to per-channel batch statistics (wrapper side).
    count = jnp.float32(n * hout * wout)
    s_c = jnp.sum(s, axis=0).reshape(wout, cout).sum(axis=0)
    ss_c = jnp.sum(ss, axis=0).reshape(wout, cout).sum(axis=0)
    mean = s_c / count
    var = jnp.maximum(ss_c / count - mean * mean, 0.0)          # biased var (PyTorch train BN)
    a_c = gamma.astype(jnp.float32) * jax.lax.rsqrt(var + BN_EPS)
    b_c = beta.astype(jnp.float32) - mean * a_c
    a = jnp.tile(a_c, wout).reshape(1, 1, ldim)                 # broadcast to packed lanes
    b = jnp.tile(b_c, wout).reshape(1, 1, ldim)
    return y, a, b, hout, wout


# -------------------------- Pass B: normalize (+shortcut merge) + ReLU --------------------------

def _bn_relu_kernel(y_ref, a_ref, b_ref, o_ref):
    y = y_ref[...].astype(jnp.float32)
    o_ref[...] = jnp.maximum(y * a_ref[...] + b_ref[...], 0.0).astype(o_ref.dtype)


def _bn_merge_relu_kernel(y_ref, a_ref, b_ref, s_ref, sa_ref, sb_ref, o_ref):
    z = (y_ref[...].astype(jnp.float32) * a_ref[...] + b_ref[...]
         + s_ref[...].astype(jnp.float32) * sa_ref[...] + sb_ref[...])
    o_ref[...] = jnp.maximum(z, 0.0).astype(o_ref.dtype)


def _bn_relu(y, a, b, out_dtype):
    n, hout, ldim = y.shape
    tile = pl.BlockSpec((None, hout, ldim), lambda i: (i, 0, 0))
    vec = pl.BlockSpec((None, 1, ldim), lambda i: (0, 0, 0))
    return pl.pallas_call(
        _bn_relu_kernel,
        out_shape=jax.ShapeDtypeStruct((n, hout, ldim), out_dtype),
        grid=(n,),
        in_specs=[tile, vec, vec],
        out_specs=tile,
        compiler_params=pltpu.CompilerParams(
            dimension_semantics=("parallel",), vmem_limit_bytes=VMEM_LIMIT),
    )(y, a, b)


def _bn_merge_relu(y, a, b, sc, sa, sb, out_dtype):
    n, hout, ldim = y.shape
    tile = pl.BlockSpec((None, hout, ldim), lambda i: (i, 0, 0))
    vec = pl.BlockSpec((None, 1, ldim), lambda i: (0, 0, 0))
    return pl.pallas_call(
        _bn_merge_relu_kernel,
        out_shape=jax.ShapeDtypeStruct((n, hout, ldim), out_dtype),
        grid=(n,),
        in_specs=[tile, vec, vec, tile, vec, vec],
        out_specs=tile,
        compiler_params=pltpu.CompilerParams(
            dimension_semantics=("parallel",), vmem_limit_bytes=VMEM_LIMIT),
    )(y, a, b, sc, sa, sb)


# ----------------------------------- ResNet_block forward -----------------------------------

def resnet_block_forward(x_nchw, p, stride):
    """x_nchw: (N, Cin, H, W) f32 -> (N, Cout, Hout, Wout) f32 (train-mode BN semantics)."""
    n, cin, h, w = x_nchw.shape
    cout = p["w1"].shape[0]

    # One NCHW -> packed-NHWC transform at the block boundary (lane dim = W*C).
    x = jnp.transpose(x_nchw, (0, 2, 3, 1)).astype(jnp.bfloat16).reshape(n, h, w * cin)

    # residual layer 1: Conv3x3(stride, pad=1) + BN + ReLU   (conv bias cancels under BN)
    y1, a1, b1, hout, wout = _conv_bn_stats(x, p["w1"], p["g1"], p["be1"], stride, 1)
    h1 = _bn_relu(y1, a1, b1, jnp.bfloat16)                    # (N, Hout, Wout*Cout) bf16

    # residual layer 2: Conv3x3(1, pad=1) + BN   (ReLU deferred to the merge)
    y2, a2, b2, _, _ = _conv_bn_stats(h1, p["w2"], p["g2"], p["be2"], 1, 1)

    # shortcut
    if stride == 1 and cin == cout:
        sc = x                                                 # identity, already packed, no copy
        sa = jnp.ones((1, 1, wout * cout), jnp.float32)
        sb = jnp.zeros((1, 1, wout * cout), jnp.float32)
    else:
        sc, sa, sb, _, _ = _conv_bn_stats(x, p["w3"], p["g3"], p["be3"], stride, 0)

    out = _bn_merge_relu(y2, a2, b2, sc, sa, sb, jnp.float32)
    out = out.reshape(n, hout, wout, cout)
    return jnp.transpose(out, (0, 3, 1, 2))


# ------------------- pure-JAX reference (PyTorch semantics, bf16 MXU operands) -------------------

def _ref_conv_bn(x, w, b, gamma, beta, stride, padding, relu):
    y = jax.lax.conv_general_dilated(
        x.astype(jnp.bfloat16), w.astype(jnp.bfloat16),
        window_strides=(stride, stride),
        padding=[(padding, padding), (padding, padding)],
        dimension_numbers=("NCHW", "OIHW", "NCHW"),
        preferred_element_type=jnp.float32)
    y = y + b.reshape(1, -1, 1, 1).astype(jnp.float32)
    mean = jnp.mean(y, axis=(0, 2, 3), keepdims=True)
    var = jnp.mean(jnp.square(y - mean), axis=(0, 2, 3), keepdims=True)
    out = (y - mean) * jax.lax.rsqrt(var + BN_EPS)
    out = out * gamma.reshape(1, -1, 1, 1) + beta.reshape(1, -1, 1, 1)
    return jnp.maximum(out, 0.0) if relu else out


def resnet_block_ref(x, p, stride):
    h1 = _ref_conv_bn(x, p["w1"], p["b1"], p["g1"], p["be1"], stride, 1, relu=True)
    r = _ref_conv_bn(h1, p["w2"], p["b2"], p["g2"], p["be2"], 1, 1, relu=False)
    cin, cout = x.shape[1], p["w1"].shape[0]
    if stride == 1 and cin == cout:
        out = r + x
    else:
        e = _ref_conv_bn(x, p["w3"], p["b3"], p["g3"], p["be3"], stride, 0, relu=False)
        out = r + e
    return jnp.maximum(out, 0.0)


if __name__ == "__main__":
    # ResNet_block(num_input=4, num_output=8, stride=1): Cin != Cout -> expand (1x1 conv) shortcut.
    N, CIN, H, W = 2, 4, 16, 16
    COUT, STRIDE = 8, 1

    key = jax.random.PRNGKey(0)
    ks = jax.random.split(key, 8)
    x = jax.random.normal(ks[0], (N, CIN, H, W), dtype=jnp.float32)

    def conv_init(k, cout, cin, kh, kw):
        kw_, kb_ = jax.random.split(k)
        return (0.1 * jax.random.normal(kw_, (cout, cin, kh, kw), dtype=jnp.float32),
                0.01 * jax.random.normal(kb_, (cout,), dtype=jnp.float32))

    w1, b1 = conv_init(ks[1], COUT, CIN, 3, 3)
    w2, b2 = conv_init(ks[2], COUT, COUT, 3, 3)
    w3, b3 = conv_init(ks[3], COUT, CIN, 1, 1)
    g1 = 1.0 + 0.1 * jax.random.normal(ks[4], (COUT,), dtype=jnp.float32)
    g2 = 1.0 + 0.1 * jax.random.normal(ks[5], (COUT,), dtype=jnp.float32)
    g3 = 1.0 + 0.1 * jax.random.normal(ks[6], (COUT,), dtype=jnp.float32)
    be1 = 0.05 * jax.random.normal(ks[7], (COUT,), dtype=jnp.float32)
    be2 = jnp.zeros((COUT,), jnp.float32)
    be3 = jnp.zeros((COUT,), jnp.float32)

    params = dict(w1=w1, b1=b1, g1=g1, be1=be1,
                  w2=w2, b2=b2, g2=g2, be2=be2,
                  w3=w3, b3=b3, g3=g3, be3=be3)

    fwd = jax.jit(resnet_block_forward, static_argnames=("stride",))
    out = fwd(x, params, stride=STRIDE)
    jax.block_until_ready(out)

    assert out.shape == (N, COUT, H, W), out.shape
    assert bool(jnp.all(out >= 0.0))                 # ReLU post-condition

    # Reference keeps the conv biases (they cancel exactly under train-mode BN) and f32
    # conv outputs; the kernel stores activations in bf16, so allow a bf16-scale tolerance.
    ref = resnet_block_ref(x, params, STRIDE)
    max_err = float(jnp.max(jnp.abs(out - ref)))
    mean_err = float(jnp.mean(jnp.abs(out - ref)))
    assert max_err < 1e-1 and mean_err < 2e-2, (max_err, mean_err)
    print("KERNEL_OK")
</pallas_src>

<mosaic_0001>
module attributes {stable_mosaic.version = 11 : i64} {
  func.func @_conv_stats_kernel(%arg0: i32, %arg1: memref<1x18x72xbf16, #tpu.memory_space<vmem>>, %arg2: memref<3x72x128xbf16, #tpu.memory_space<vmem>>, %arg3: memref<1x16x128xbf16, #tpu.memory_space<vmem>>, %arg4: memref<1x1x128xf32, #tpu.memory_space<vmem>>, %arg5: memref<1x1x128xf32, #tpu.memory_space<vmem>>) attributes {dimension_semantics = [#tpu.dimension_semantics<parallel>], iteration_bounds = array<i64: 2>, scalar_prefetch = 0 : i64, scratch_operands = 0 : i64, tpu.core_type = #tpu.core_type<tc>, window_params = [{transform_indices = @transform_0, window_bounds = array<i64: 1, 18, 72>}, {pipeline_mode = #tpu.pipeline_mode<synchronous>, transform_indices = @transform_1, window_bounds = array<i64: 3, 72, 128>}, {transform_indices = @transform_2, window_bounds = array<i64: 1, 16, 128>}, {transform_indices = @transform_3, window_bounds = array<i64: 1, 1, 128>}, {transform_indices = @transform_4, window_bounds = array<i64: 1, 1, 128>}]} {
    %c0 = arith.constant 0 : index
    %c0_0 = arith.constant 0 : index
    %c0_1 = arith.constant 0 : index
    %0 = vector.load %arg1[%c0, %c0_0, %c0_1] : memref<1x18x72xbf16, #tpu.memory_space<vmem>>, vector<1x16x72xbf16>
    %1 = vector.shape_cast %0 : vector<1x16x72xbf16> to vector<16x72xbf16>
    %c0_2 = arith.constant 0 : index
    %c0_3 = arith.constant 0 : index
    %c0_4 = arith.constant 0 : index
    %2 = vector.load %arg2[%c0_2, %c0_3, %c0_4] : memref<3x72x128xbf16, #tpu.memory_space<vmem>>, vector<1x72x128xbf16>
    %3 = vector.shape_cast %2 : vector<1x72x128xbf16> to vector<72x128xbf16>
    %cst = arith.constant dense<0.000000e+00> : vector<16x128xf32>
    %4 = tpu.matmul %1, %3, %cst {dimension_numbers = #tpu.dot_dimension_numbers<[1], [0], [0], [1], [0, 0, 1, 1], [], []>} : vector<16x72xbf16>, vector<72x128xbf16>, vector<16x128xf32> -> vector<16x128xf32>
    %c0_5 = arith.constant 0 : index
    %c1 = arith.constant 1 : index
    %c0_6 = arith.constant 0 : index
    %5 = vector.load %arg1[%c0_5, %c1, %c0_6] : memref<1x18x72xbf16, #tpu.memory_space<vmem>>, vector<1x16x72xbf16>
    %6 = vector.shape_cast %5 : vector<1x16x72xbf16> to vector<16x72xbf16>
    %c1_7 = arith.constant 1 : index
    %c0_8 = arith.constant 0 : index
    %c0_9 = arith.constant 0 : index
    %7 = vector.load %arg2[%c1_7, %c0_8, %c0_9] : memref<3x72x128xbf16, #tpu.memory_space<vmem>>, vector<1x72x128xbf16>
    %8 = vector.shape_cast %7 : vector<1x72x128xbf16> to vector<72x128xbf16>
    %cst_10 = arith.constant dense<0.000000e+00> : vector<16x128xf32>
    %9 = tpu.matmul %6, %8, %cst_10 {dimension_numbers = #tpu.dot_dimension_numbers<[1], [0], [0], [1], [0, 0, 1, 1], [], []>} : vector<16x72xbf16>, vector<72x128xbf16>, vector<16x128xf32> -> vector<16x128xf32>
    %10 = arith.addf %4, %9 : vector<16x128xf32>
    %c0_11 = arith.constant 0 : index
    %c2 = arith.constant 2 : index
    %c0_12 = arith.constant 0 : index
    %11 = vector.load %arg1[%c0_11, %c2, %c0_12] : memref<1x18x72xbf16, #tpu.memory_space<vmem>>, vector<1x16x72xbf16>
    %12 = vector.shape_cast %11 : vector<1x16x72xbf16> to vector<16x72xbf16>
    %c2_13 = arith.constant 2 : index
    %c0_14 = arith.constant 0 : index
    %c0_15 = arith.constant 0 : index
    %13 = vector.load %arg2[%c2_13, %c0_14, %c0_15] : memref<3x72x128xbf16, #tpu.memory_space<vmem>>, vector<1x72x128xbf16>
    %14 = vector.shape_cast %13 : vector<1x72x128xbf16> to vector<72x128xbf16>
    %cst_16 = arith.constant dense<0.000000e+00> : vector<16x128xf32>
    %15 = tpu.matmul %12, %14, %cst_16 {dimension_numbers = #tpu.dot_dimension_numbers<[1], [0], [0], [1], [0, 0, 1, 1], [], []>} : vector<16x72xbf16>, vector<72x128xbf16>, vector<16x128xf32> -> vector<16x128xf32>
    %16 = arith.addf %10, %15 : vector<16x128xf32>
    %17 = arith.truncf %16 : vector<16x128xf32> to vector<16x128xbf16>
    %c0_17 = arith.constant 0 : index
    %c0_18 = arith.constant 0 : index
    %c0_19 = arith.constant 0 : index
    %18 = vector.load %arg3[%c0_17, %c0_18, %c0_19] : memref<1x16x128xbf16, #tpu.memory_space<vmem>>, vector<1x16x128xbf16>
    %19 = vector.shape_cast %18 : vector<1x16x128xbf16> to vector<16x128xbf16>
    %20 = vector.shape_cast %17 : vector<16x128xbf16> to vector<1x16x128xbf16>
    tpu.vector_store %arg3[%c0_17, %c0_18, %c0_19], %20 {strides = array<i32>} : memref<1x16x128xbf16, #tpu.memory_space<vmem>>, vector<1x16x128xbf16>,
    %cst_20 = arith.constant dense<0.000000e+00> : vector<128xf32>
    %21 = vector.multi_reduction <add>, %16, %cst_20 [0] : vector<16x128xf32> to vector<128xf32>
    %22 = vector.shape_cast %21 : vector<128xf32> to vector<1x128xf32>
    %c0_21 = arith.constant 0 : index
    %c0_22 = arith.constant 0 : index
    %c0_23 = arith.constant 0 : index
    %23 = vector.load %arg4[%c0_21, %c0_22, %c0_23] : memref<1x1x128xf32, #tpu.memory_space<vmem>>, vector<1x1x128xf32>
    %24 = vector.shape_cast %23 : vector<1x1x128xf32> to vector<1x128xf32>
    %25 = vector.shape_cast %22 : vector<1x128xf32> to vector<1x1x128xf32>
    tpu.vector_store %arg4[%c0_21, %c0_22, %c0_23], %25 {strides = array<i32>} : memref<1x1x128xf32, #tpu.memory_space<vmem>>, vector<1x1x128xf32>,
    %26 = arith.mulf %16, %16 : vector<16x128xf32>
    %cst_24 = arith.constant dense<0.000000e+00> : vector<128xf32>
    %27 = vector.multi_reduction <add>, %26, %cst_24 [0] : vector<16x128xf32> to vector<128xf32>
    %28 = vector.shape_cast %27 : vector<128xf32> to vector<1x128xf32>
    %c0_25 = arith.constant 0 : index
    %c0_26 = arith.constant 0 : index
    %c0_27 = arith.constant 0 : index
    %29 = vector.load %arg5[%c0_25, %c0_26, %c0_27] : memref<1x1x128xf32, #tpu.memory_space<vmem>>, vector<1x1x128xf32>
    %30 = vector.shape_cast %29 : vector<1x1x128xf32> to vector<1x128xf32>
    %31 = vector.shape_cast %28 : vector<1x128xf32> to vector<1x1x128xf32>
    tpu.vector_store %arg5[%c0_25, %c0_26, %c0_27], %31 {strides = array<i32>} : memref<1x1x128xf32, #tpu.memory_space<vmem>>, vector<1x1x128xf32>,
    return
  }
  func.func @transform_0(%arg0: i32) -> (i32, i32, i32) {
    %c0_i32 = arith.constant 0 : i32
    %c0_i32_0 = arith.constant 0 : i32
    %c0_i32_1 = arith.constant 0 : i32
    return %arg0, %c0_i32, %c0_i32_0 : i32, i32, i32
  }
  func.func @transform_1(%arg0: i32) -> (i32, i32, i32) {
    %c0_i32 = arith.constant 0 : i32
    %c0_i32_0 = arith.constant 0 : i32
    %c0_i32_1 = arith.constant 0 : i32
    %c0_i32_2 = arith.constant 0 : i32
    return %c0_i32, %c0_i32_0, %c0_i32_1 : i32, i32, i32
  }
  func.func @transform_2(%arg0: i32) -> (i32, i32, i32) {
    %c0_i32 = arith.constant 0 : i32
    %c0_i32_0 = arith.constant 0 : i32
    %c0_i32_1 = arith.constant 0 : i32
    return %arg0, %c0_i32, %c0_i32_0 : i32, i32, i32
  }
  func.func @transform_3(%arg0: i32) -> (i32, i32, i32) {
    %c0_i32 = arith.constant 0 : i32
    %c0_i32_0 = arith.constant 0 : i32
    %c0_i32_1 = arith.constant 0 : i32
    return %arg0, %c0_i32, %c0_i32_0 : i32, i32, i32
  }
  func.func @transform_4(%arg0: i32) -> (i32, i32, i32) {
    %c0_i32 = arith.constant 0 : i32
    %c0_i32_0 = arith.constant 0 : i32
    %c0_i32_1 = arith.constant 0 : i32
    return %arg0, %c0_i32, %c0_i32_0 : i32, i32, i32
  }
}

module attributes {stable_mosaic.version = 11 : i64} {
  func.func @_bn_relu_kernel(%arg0: i32, %arg1: memref<1x16x128xbf16, #tpu.memory_space<vmem>>, %arg2: memref<1x1x128xf32, #tpu.memory_space<vmem>>, %arg3: memref<1x1x128xf32, #tpu.memory_space<vmem>>, %arg4: memref<1x16x128xbf16, #tpu.memory_space<vmem>>) attributes {dimension_semantics = [#tpu.dimension_semantics<parallel>], iteration_bounds = array<i64: 2>, scalar_prefetch = 0 : i64, scratch_operands = 0 : i64, tpu.core_type = #tpu.core_type<tc>, window_params = [{transform_indices = @transform_0, window_bounds = array<i64: 1, 16, 128>}, {pipeline_mode = #tpu.pipeline_mode<synchronous>, transform_indices = @transform_1, window_bounds = array<i64: 1, 1, 128>}, {pipeline_mode = #tpu.pipeline_mode<synchronous>, transform_indices = @transform_2, window_bounds = array<i64: 1, 1, 128>}, {transform_indices = @transform_3, window_bounds = array<i64: 1, 16, 128>}]} {
    %c0 = arith.constant 0 : index
    %c0_0 = arith.constant 0 : index
    %c0_1 = arith.constant 0 : index
    %0 = vector.load %arg1[%c0, %c0_0, %c0_1] : memref<1x16x128xbf16, #tpu.memory_space<vmem>>, vector<1x16x128xbf16>
    %1 = vector.shape_cast %0 : vector<1x16x128xbf16> to vector<16x128xbf16>
    %2 = arith.extf %1 : vector<16x128xbf16> to vector<16x128xf32>
    %c0_2 = arith.constant 0 : index
    %c0_3 = arith.constant 0 : index
    %c0_4 = arith.constant 0 : index
    %3 = vector.load %arg2[%c0_2, %c0_3, %c0_4] : memref<1x1x128xf32, #tpu.memory_space<vmem>>, vector<1x1x128xf32>
    %4 = vector.shape_cast %3 : vector<1x1x128xf32> to vector<1x128xf32>
    %5 = vector.broadcast %4 : vector<1x128xf32> to vector<16x128xf32>
    %6 = arith.mulf %2, %5 : vector<16x128xf32>
    %c0_5 = arith.constant 0 : index
    %c0_6 = arith.constant 0 : index
    %c0_7 = arith.constant 0 : index
    %7 = vector.load %arg3[%c0_5, %c0_6, %c0_7] : memref<1x1x128xf32, #tpu.memory_space<vmem>>, vector<1x1x128xf32>
    %8 = vector.shape_cast %7 : vector<1x1x128xf32> to vector<1x128xf32>
    %9 = vector.broadcast %8 : vector<1x128xf32> to vector<16x128xf32>
    %10 = arith.addf %6, %9 : vector<16x128xf32>
    %cst = arith.constant 0.000000e+00 : f32
    %11 = vector.broadcast %cst : f32 to vector<16x128xf32>
    %12 = arith.maximumf %10, %11 : vector<16x128xf32>
    %13 = arith.truncf %12 : vector<16x128xf32> to vector<16x128xbf16>
    %c0_8 = arith.constant 0 : index
    %c0_9 = arith.constant 0 : index
    %c0_10 = arith.constant 0 : index
    %14 = vector.load %arg4[%c0_8, %c0_9, %c0_10] : memref<1x16x128xbf16, #tpu.memory_space<vmem>>, vector<1x16x128xbf16>
    %15 = vector.shape_cast %14 : vector<1x16x128xbf16> to vector<16x128xbf16>
    %16 = vector.shape_cast %13 : vector<16x128xbf16> to vector<1x16x128xbf16>
    tpu.vector_store %arg4[%c0_8, %c0_9, %c0_10], %16 {strides = array<i32>} : memref<1x16x128xbf16, #tpu.memory_space<vmem>>, vector<1x16x128xbf16>,
    return
  }
  func.func @transform_0(%arg0: i32) -> (i32, i32, i32) {
    %c0_i32 = arith.constant 0 : i32
    %c0_i32_0 = arith.constant 0 : i32
    %c0_i32_1 = arith.constant 0 : i32
    return %arg0, %c0_i32, %c0_i32_0 : i32, i32, i32
  }
  func.func @transform_1(%arg0: i32) -> (i32, i32, i32) {
    %c0_i32 = arith.constant 0 : i32
    %c0_i32_0 = arith.constant 0 : i32
    %c0_i32_1 = arith.constant 0 : i32
    %c0_i32_2 = arith.constant 0 : i32
    return %c0_i32, %c0_i32_0, %c0_i32_1 : i32, i32, i32
  }
  func.func @transform_2(%arg0: i32) -> (i32, i32, i32) {
    %c0_i32 = arith.constant 0 : i32
    %c0_i32_0 = arith.constant 0 : i32
    %c0_i32_1 = arith.constant 0 : i32
    %c0_i32_2 = arith.constant 0 : i32
    return %c0_i32, %c0_i32_0, %c0_i32_1 : i32, i32, i32
  }
  func.func @transform_3(%arg0: i32) -> (i32, i32, i32) {
    %c0_i32 = arith.constant 0 : i32
    %c0_i32_0 = arith.constant 0 : i32
    %c0_i32_1 = arith.constant 0 : i32
    return %arg0, %c0_i32, %c0_i32_0 : i32, i32, i32
  }
}

module attributes {stable_mosaic.version = 11 : i64} {
  func.func @_conv_stats_kernel(%arg0: i32, %arg1: memref<1x18x144xbf16, #tpu.memory_space<vmem>>, %arg2: memref<3x144x128xbf16, #tpu.memory_space<vmem>>, %arg3: memref<1x16x128xbf16, #tpu.memory_space<vmem>>, %arg4: memref<1x1x128xf32, #tpu.memory_space<vmem>>, %arg5: memref<1x1x128xf32, #tpu.memory_space<vmem>>) attributes {dimension_semantics = [#tpu.dimension_semantics<parallel>], iteration_bounds = array<i64: 2>, scalar_prefetch = 0 : i64, scratch_operands = 0 : i64, tpu.core_type = #tpu.core_type<tc>, window_params = [{transform_indices = @transform_0, window_bounds = array<i64: 1, 18, 144>}, {pipeline_mode = #tpu.pipeline_mode<synchronous>, transform_indices = @transform_1, window_bounds = array<i64: 3, 144, 128>}, {transform_indices = @transform_2, window_bounds = array<i64: 1, 16, 128>}, {transform_indices = @transform_3, window_bounds = array<i64: 1, 1, 128>}, {transform_indices = @transform_4, window_bounds = array<i64: 1, 1, 128>}]} {
    %c0 = arith.constant 0 : index
    %c0_0 = arith.constant 0 : index
    %c0_1 = arith.constant 0 : index
    %0 = vector.load %arg1[%c0, %c0_0, %c0_1] : memref<1x18x144xbf16, #tpu.memory_space<vmem>>, vector<1x16x144xbf16>
    %1 = vector.shape_cast %0 : vector<1x16x144xbf16> to vector<16x144xbf16>
    %c0_2 = arith.constant 0 : index
    %c0_3 = arith.constant 0 : index
    %c0_4 = arith.constant 0 : index
    %2 = vector.load %arg2[%c0_2, %c0_3, %c0_4] : memref<3x144x128xbf16, #tpu.memory_space<vmem>>, vector<1x144x128xbf16>
    %3 = vector.shape_cast %2 : vector<1x144x128xbf16> to vector<144x128xbf16>
    %cst = arith.constant dense<0.000000e+00> : vector<16x128xf32>
    %4 = tpu.matmul %1, %3, %cst {dimension_numbers = #tpu.dot_dimension_numbers<[1], [0], [0], [1], [0, 0, 1, 1], [], []>} : vector<16x144xbf16>, vector<144x128xbf16>, vector<16x128xf32> -> vector<16x128xf32>
    %c0_5 = arith.constant 0 : index
    %c1 = arith.constant 1 : index
    %c0_6 = arith.constant 0 : index
    %5 = vector.load %arg1[%c0_5, %c1, %c0_6] : memref<1x18x144xbf16, #tpu.memory_space<vmem>>, vector<1x16x144xbf16>
    %6 = vector.shape_cast %5 : vector<1x16x144xbf16> to vector<16x144xbf16>
    %c1_7 = arith.constant 1 : index
    %c0_8 = arith.constant 0 : index
    %c0_9 = arith.constant 0 : index
    %7 = vector.load %arg2[%c1_7, %c0_8, %c0_9] : memref<3x144x128xbf16, #tpu.memory_space<vmem>>, vector<1x144x128xbf16>
    %8 = vector.shape_cast %7 : vector<1x144x128xbf16> to vector<144x128xbf16>
    %cst_10 = arith.constant dense<0.000000e+00> : vector<16x128xf32>
    %9 = tpu.matmul %6, %8, %cst_10 {dimension_numbers = #tpu.dot_dimension_numbers<[1], [0], [0], [1], [0, 0, 1, 1], [], []>} : vector<16x144xbf16>, vector<144x128xbf16>, vector<16x128xf32> -> vector<16x128xf32>
    %10 = arith.addf %4, %9 : vector<16x128xf32>
    %c0_11 = arith.constant 0 : index
    %c2 = arith.constant 2 : index
    %c0_12 = arith.constant 0 : index
    %11 = vector.load %arg1[%c0_11, %c2, %c0_12] : memref<1x18x144xbf16, #tpu.memory_space<vmem>>, vector<1x16x144xbf16>
    %12 = vector.shape_cast %11 : vector<1x16x144xbf16> to vector<16x144xbf16>
    %c2_13 = arith.constant 2 : index
    %c0_14 = arith.constant 0 : index
    %c0_15 = arith.constant 0 : index
    %13 = vector.load %arg2[%c2_13, %c0_14, %c0_15] : memref<3x144x128xbf16, #tpu.memory_space<vmem>>, vector<1x144x128xbf16>
    %14 = vector.shape_cast %13 : vector<1x144x128xbf16> to vector<144x128xbf16>
    %cst_16 = arith.constant dense<0.000000e+00> : vector<16x128xf32>
    %15 = tpu.matmul %12, %14, %cst_16 {dimension_numbers = #tpu.dot_dimension_numbers<[1], [0], [0], [1], [0, 0, 1, 1], [], []>} : vector<16x144xbf16>, vector<144x128xbf16>, vector<16x128xf32> -> vector<16x128xf32>
    %16 = arith.addf %10, %15 : vector<16x128xf32>
    %17 = arith.truncf %16 : vector<16x128xf32> to vector<16x128xbf16>
    %c0_17 = arith.constant 0 : index
    %c0_18 = arith.constant 0 : index
    %c0_19 = arith.constant 0 : index
    %18 = vector.load %arg3[%c0_17, %c0_18, %c0_19] : memref<1x16x128xbf16, #tpu.memory_space<vmem>>, vector<1x16x128xbf16>
    %19 = vector.shape_cast %18 : vector<1x16x128xbf16> to vector<16x128xbf16>
    %20 = vector.shape_cast %17 : vector<16x128xbf16> to vector<1x16x128xbf16>
    tpu.vector_store %arg3[%c0_17, %c0_18, %c0_19], %20 {strides = array<i32>} : memref<1x16x128xbf16, #tpu.memory_space<vmem>>, vector<1x16x128xbf16>,
    %cst_20 = arith.constant dense<0.000000e+00> : vector<128xf32>
    %21 = vector.multi_reduction <add>, %16, %cst_20 [0] : vector<16x128xf32> to vector<128xf32>
    %22 = vector.shape_cast %21 : vector<128xf32> to vector<1x128xf32>
    %c0_21 = arith.constant 0 : index
    %c0_22 = arith.constant 0 : index
    %c0_23 = arith.constant 0 : index
    %23 = vector.load %arg4[%c0_21, %c0_22, %c0_23] : memref<1x1x128xf32, #tpu.memory_space<vmem>>, vector<1x1x128xf32>
    %24 = vector.shape_cast %23 : vector<1x1x128xf32> to vector<1x128xf32>
    %25 = vector.shape_cast %22 : vector<1x128xf32> to vector<1x1x128xf32>
    tpu.vector_store %arg4[%c0_21, %c0_22, %c0_23], %25 {strides = array<i32>} : memref<1x1x128xf32, #tpu.memory_space<vmem>>, vector<1x1x128xf32>,
    %26 = arith.mulf %16, %16 : vector<16x128xf32>
    %cst_24 = arith.constant dense<0.000000e+00> : vector<128xf32>
    %27 = vector.multi_reduction <add>, %26, %cst_24 [0] : vector<16x128xf32> to vector<128xf32>
    %28 = vector.shape_cast %27 : vector<128xf32> to vector<1x128xf32>
    %c0_25 = arith.constant 0 : index
    %c0_26 = arith.constant 0 : index
    %c0_27 = arith.constant 0 : index
    %29 = vector.load %arg5[%c0_25, %c0_26, %c0_27] : memref<1x1x128xf32, #tpu.memory_space<vmem>>, vector<1x1x128xf32>
    %30 = vector.shape_cast %29 : vector<1x1x128xf32> to vector<1x128xf32>
    %31 = vector.shape_cast %28 : vector<1x128xf32> to vector<1x1x128xf32>
    tpu.vector_store %arg5[%c0_25, %c0_26, %c0_27], %31 {strides = array<i32>} : memref<1x1x128xf32, #tpu.memory_space<vmem>>, vector<1x1x128xf32>,
    return
  }
  func.func @transform_0(%arg0: i32) -> (i32, i32, i32) {
    %c0_i32 = arith.constant 0 : i32
    %c0_i32_0 = arith.constant 0 : i32
    %c0_i32_1 = arith.constant 0 : i32
    return %arg0, %c0_i32, %c0_i32_0 : i32, i32, i32
  }
  func.func @transform_1(%arg0: i32) -> (i32, i32, i32) {
    %c0_i32 = arith.constant 0 : i32
    %c0_i32_0 = arith.constant 0 : i32
    %c0_i32_1 = arith.constant 0 : i32
    %c0_i32_2 = arith.constant 0 : i32
    return %c0_i32, %c0_i32_0, %c0_i32_1 : i32, i32, i32
  }
  func.func @transform_2(%arg0: i32) -> (i32, i32, i32) {
    %c0_i32 = arith.constant 0 : i32
    %c0_i32_0 = arith.constant 0 : i32
    %c0_i32_1 = arith.constant 0 : i32
    return %arg0, %c0_i32, %c0_i32_0 : i32, i32, i32
  }
  func.func @transform_3(%arg0: i32) -> (i32, i32, i32) {
    %c0_i32 = arith.constant 0 : i32
    %c0_i32_0 = arith.constant 0 : i32
    %c0_i32_1 = arith.constant 0 : i32
    return %arg0, %c0_i32, %c0_i32_0 : i32, i32, i32
  }
  func.func @transform_4(%arg0: i32) -> (i32, i32, i32) {
    %c0_i32 = arith.constant 0 : i32
    %c0_i32_0 = arith.constant 0 : i32
    %c0_i32_1 = arith.constant 0 : i32
    return %arg0, %c0_i32, %c0_i32_0 : i32, i32, i32
  }
}

module attributes {stable_mosaic.version = 11 : i64} {
  func.func @_bn_merge_relu_kernel(%arg0: i32, %arg1: memref<1x16x128xbf16, #tpu.memory_space<vmem>>, %arg2: memref<1x1x128xf32, #tpu.memory_space<vmem>>, %arg3: memref<1x1x128xf32, #tpu.memory_space<vmem>>, %arg4: memref<1x16x128xbf16, #tpu.memory_space<vmem>>, %arg5: memref<1x1x128xf32, #tpu.memory_space<vmem>>, %arg6: memref<1x1x128xf32, #tpu.memory_space<vmem>>, %arg7: memref<1x16x128xf32, #tpu.memory_space<vmem>>) attributes {dimension_semantics = [#tpu.dimension_semantics<parallel>], iteration_bounds = array<i64: 2>, scalar_prefetch = 0 : i64, scratch_operands = 0 : i64, tpu.core_type = #tpu.core_type<tc>, window_params = [{transform_indices = @transform_0, window_bounds = array<i64: 1, 16, 128>}, {pipeline_mode = #tpu.pipeline_mode<synchronous>, transform_indices = @transform_1, window_bounds = array<i64: 1, 1, 128>}, {pipeline_mode = #tpu.pipeline_mode<synchronous>, transform_indices = @transform_2, window_bounds = array<i64: 1, 1, 128>}, {transform_indices = @transform_3, window_bounds = array<i64: 1, 16, 128>}, {pipeline_mode = #tpu.pipeline_mode<synchronous>, transform_indices = @transform_4, window_bounds = array<i64: 1, 1, 128>}, {pipeline_mode = #tpu.pipeline_mode<synchronous>, transform_indices = @transform_5, window_bounds = array<i64: 1, 1, 128>}, {transform_indices = @transform_6, window_bounds = array<i64: 1, 16, 128>}]} {
    %c0 = arith.constant 0 : index
    %c0_0 = arith.constant 0 : index
    %c0_1 = arith.constant 0 : index
    %0 = vector.load %arg1[%c0, %c0_0, %c0_1] : memref<1x16x128xbf16, #tpu.memory_space<vmem>>, vector<1x16x128xbf16>
    %1 = vector.shape_cast %0 : vector<1x16x128xbf16> to vector<16x128xbf16>
    %2 = arith.extf %1 : vector<16x128xbf16> to vector<16x128xf32>
    %c0_2 = arith.constant 0 : index
    %c0_3 = arith.constant 0 : index
    %c0_4 = arith.constant 0 : index
    %3 = vector.load %arg2[%c0_2, %c0_3, %c0_4] : memref<1x1x128xf32, #tpu.memory_space<vmem>>, vector<1x1x128xf32>
    %4 = vector.shape_cast %3 : vector<1x1x128xf32> to vector<1x128xf32>
    %5 = vector.broadcast %4 : vector<1x128xf32> to vector<16x128xf32>
    %6 = arith.mulf %2, %5 : vector<16x128xf32>
    %c0_5 = arith.constant 0 : index
    %c0_6 = arith.constant 0 : index
    %c0_7 = arith.constant 0 : index
    %7 = vector.load %arg3[%c0_5, %c0_6, %c0_7] : memref<1x1x128xf32, #tpu.memory_space<vmem>>, vector<1x1x128xf32>
    %8 = vector.shape_cast %7 : vector<1x1x128xf32> to vector<1x128xf32>
    %9 = vector.broadcast %8 : vector<1x128xf32> to vector<16x128xf32>
    %10 = arith.addf %6, %9 : vector<16x128xf32>
    %c0_8 = arith.constant 0 : index
    %c0_9 = arith.constant 0 : index
    %c0_10 = arith.constant 0 : index
    %11 = vector.load %arg4[%c0_8, %c0_9, %c0_10] : memref<1x16x128xbf16, #tpu.memory_space<vmem>>, vector<1x16x128xbf16>
    %12 = vector.shape_cast %11 : vector<1x16x128xbf16> to vector<16x128xbf16>
    %13 = arith.extf %12 : vector<16x128xbf16> to vector<16x128xf32>
    %c0_11 = arith.constant 0 : index
    %c0_12 = arith.constant 0 : index
    %c0_13 = arith.constant 0 : index
    %14 = vector.load %arg5[%c0_11, %c0_12, %c0_13] : memref<1x1x128xf32, #tpu.memory_space<vmem>>, vector<1x1x128xf32>
    %15 = vector.shape_cast %14 : vector<1x1x128xf32> to vector<1x128xf32>
    %16 = vector.broadcast %15 : vector<1x128xf32> to vector<16x128xf32>
    %17 = arith.mulf %13, %16 : vector<16x128xf32>
    %18 = arith.addf %10, %17 : vector<16x128xf32>
    %c0_14 = arith.constant 0 : index
    %c0_15 = arith.constant 0 : index
    %c0_16 = arith.constant 0 : index
    %19 = vector.load %arg6[%c0_14, %c0_15, %c0_16] : memref<1x1x128xf32, #tpu.memory_space<vmem>>, vector<1x1x128xf32>
    %20 = vector.shape_cast %19 : vector<1x1x128xf32> to vector<1x128xf32>
    %21 = vector.broadcast %20 : vector<1x128xf32> to vector<16x128xf32>
    %22 = arith.addf %18, %21 : vector<16x128xf32>
    %cst = arith.constant 0.000000e+00 : f32
    %23 = vector.broadcast %cst : f32 to vector<16x128xf32>
    %24 = arith.maximumf %22, %23 : vector<16x128xf32>
    %c0_17 = arith.constant 0 : index
    %c0_18 = arith.constant 0 : index
    %c0_19 = arith.constant 0 : index
    %25 = vector.load %arg7[%c0_17, %c0_18, %c0_19] : memref<1x16x128xf32, #tpu.memory_space<vmem>>, vector<1x16x128xf32>
    %26 = vector.shape_cast %25 : vector<1x16x128xf32> to vector<16x128xf32>
    %27 = vector.shape_cast %24 : vector<16x128xf32> to vector<1x16x128xf32>
    tpu.vector_store %arg7[%c0_17, %c0_18, %c0_19], %27 {strides = array<i32>} : memref<1x16x128xf32, #tpu.memory_space<vmem>>, vector<1x16x128xf32>,
    return
  }
  func.func @transform_0(%arg0: i32) -> (i32, i32, i32) {
    %c0_i32 = arith.constant 0 : i32
    %c0_i32_0 = arith.constant 0 : i32
    %c0_i32_1 = arith.constant 0 : i32
    return %arg0, %c0_i32, %c0_i32_0 : i32, i32, i32
  }
  func.func @transform_1(%arg0: i32) -> (i32, i32, i32) {
    %c0_i32 = arith.constant 0 : i32
    %c0_i32_0 = arith.constant 0 : i32
    %c0_i32_1 = arith.constant 0 : i32
    %c0_i32_2 = arith.constant 0 : i32
    return %c0_i32, %c0_i32_0, %c0_i32_1 : i32, i32, i32
  }
  func.func @transform_2(%arg0: i32) -> (i32, i32, i32) {
    %c0_i32 = arith.constant 0 : i32
    %c0_i32_0 = arith.constant 0 : i32
    %c0_i32_1 = arith.constant 0 : i32
    %c0_i32_2 = arith.constant 0 : i32
    return %c0_i32, %c0_i32_0, %c0_i32_1 : i32, i32, i32
  }
  func.func @transform_3(%arg0: i32) -> (i32, i32, i32) {
    %c0_i32 = arith.constant 0 : i32
    %c0_i32_0 = arith.constant 0 : i32
    %c0_i32_1 = arith.constant 0 : i32
    return %arg0, %c0_i32, %c0_i32_0 : i32, i32, i32
  }
  func.func @transform_4(%arg0: i32) -> (i32, i32, i32) {
    %c0_i32 = arith.constant 0 : i32
    %c0_i32_0 = arith.constant 0 : i32
    %c0_i32_1 = arith.constant 0 : i32
    %c0_i32_2 = arith.constant 0 : i32
    return %c0_i32, %c0_i32_0, %c0_i32_1 : i32, i32, i32
  }
  func.func @transform_5(%arg0: i32) -> (i32, i32, i32) {
    %c0_i32 = arith.constant 0 : i32
    %c0_i32_0 = arith.constant 0 : i32
    %c0_i32_1 = arith.constant 0 : i32
    %c0_i32_2 = arith.constant 0 : i32
    return %c0_i32, %c0_i32_0, %c0_i32_1 : i32, i32, i32
  }
  func.func @transform_6(%arg0: i32) -> (i32, i32, i32) {
    %c0_i32 = arith.constant 0 : i32
    %c0_i32_0 = arith.constant 0 : i32
    %c0_i32_1 = arith.constant 0 : i32
    return %arg0, %c0_i32, %c0_i32_0 : i32, i32, i32
  }
}

module attributes {stable_mosaic.version = 11 : i64} {
  func.func @_conv_stats_kernel(%arg0: i32, %arg1: memref<1x16x64xbf16, #tpu.memory_space<vmem>>, %arg2: memref<1x64x128xbf16, #tpu.memory_space<vmem>>, %arg3: memref<1x16x128xbf16, #tpu.memory_space<vmem>>, %arg4: memref<1x1x128xf32, #tpu.memory_space<vmem>>, %arg5: memref<1x1x128xf32, #tpu.memory_space<vmem>>) attributes {dimension_semantics = [#tpu.dimension_semantics<parallel>], iteration_bounds = array<i64: 2>, scalar_prefetch = 0 : i64, scratch_operands = 0 : i64, tpu.core_type = #tpu.core_type<tc>, window_params = [{transform_indices = @transform_0, window_bounds = array<i64: 1, 16, 64>}, {pipeline_mode = #tpu.pipeline_mode<synchronous>, transform_indices = @transform_1, window_bounds = array<i64: 1, 64, 128>}, {transform_indices = @transform_2, window_bounds = array<i64: 1, 16, 128>}, {transform_indices = @transform_3, window_bounds = array<i64: 1, 1, 128>}, {transform_indices = @transform_4, window_bounds = array<i64: 1, 1, 128>}]} {
    %c0 = arith.constant 0 : index
    %c0_0 = arith.constant 0 : index
    %c0_1 = arith.constant 0 : index
    %0 = vector.load %arg1[%c0, %c0_0, %c0_1] : memref<1x16x64xbf16, #tpu.memory_space<vmem>>, vector<1x16x64xbf16>
    %1 = vector.shape_cast %0 : vector<1x16x64xbf16> to vector<16x64xbf16>
    %c0_2 = arith.constant 0 : index
    %c0_3 = arith.constant 0 : index
    %c0_4 = arith.constant 0 : index
    %2 = vector.load %arg2[%c0_2, %c0_3, %c0_4] : memref<1x64x128xbf16, #tpu.memory_space<vmem>>, vector<1x64x128xbf16>
    %3 = vector.shape_cast %2 : vector<1x64x128xbf16> to vector<64x128xbf16>
    %cst = arith.constant dense<0.000000e+00> : vector<16x128xf32>
    %4 = tpu.matmul %1, %3, %cst {dimension_numbers = #tpu.dot_dimension_numbers<[1], [0], [0], [1], [0, 0, 1, 1], [], []>} : vector<16x64xbf16>, vector<64x128xbf16>, vector<16x128xf32> -> vector<16x128xf32>
    %5 = arith.truncf %4 : vector<16x128xf32> to vector<16x128xbf16>
    %c0_5 = arith.constant 0 : index
    %c0_6 = arith.constant 0 : index
    %c0_7 = arith.constant 0 : index
    %6 = vector.load %arg3[%c0_5, %c0_6, %c0_7] : memref<1x16x128xbf16, #tpu.memory_space<vmem>>, vector<1x16x128xbf16>
    %7 = vector.shape_cast %6 : vector<1x16x128xbf16> to vector<16x128xbf16>
    %8 = vector.shape_cast %5 : vector<16x128xbf16> to vector<1x16x128xbf16>
    tpu.vector_store %arg3[%c0_5, %c0_6, %c0_7], %8 {strides = array<i32>} : memref<1x16x128xbf16, #tpu.memory_space<vmem>>, vector<1x16x128xbf16>,
    %cst_8 = arith.constant dense<0.000000e+00> : vector<128xf32>
    %9 = vector.multi_reduction <add>, %4, %cst_8 [0] : vector<16x128xf32> to vector<128xf32>
    %10 = vector.shape_cast %9 : vector<128xf32> to vector<1x128xf32>
    %c0_9 = arith.constant 0 : index
    %c0_10 = arith.constant 0 : index
    %c0_11 = arith.constant 0 : index
    %11 = vector.load %arg4[%c0_9, %c0_10, %c0_11] : memref<1x1x128xf32, #tpu.memory_space<vmem>>, vector<1x1x128xf32>
    %12 = vector.shape_cast %11 : vector<1x1x128xf32> to vector<1x128xf32>
    %13 = vector.shape_cast %10 : vector<1x128xf32> to vector<1x1x128xf32>
    tpu.vector_store %arg4[%c0_9, %c0_10, %c0_11], %13 {strides = array<i32>} : memref<1x1x128xf32, #tpu.memory_space<vmem>>, vector<1x1x128xf32>,
    %14 = arith.mulf %4, %4 : vector<16x128xf32>
    %cst_12 = arith.constant dense<0.000000e+00> : vector<128xf32>
    %15 = vector.multi_reduction <add>, %14, %cst_12 [0] : vector<16x128xf32> to vector<128xf32>
    %16 = vector.shape_cast %15 : vector<128xf32> to vector<1x128xf32>
    %c0_13 = arith.constant 0 : index
    %c0_14 = arith.constant 0 : index
    %c0_15 = arith.constant 0 : index
    %17 = vector.load %arg5[%c0_13, %c0_14, %c0_15] : memref<1x1x128xf32, #tpu.memory_space<vmem>>, vector<1x1x128xf32>
    %18 = vector.shape_cast %17 : vector<1x1x128xf32> to vector<1x128xf32>
    %19 = vector.shape_cast %16 : vector<1x128xf32> to vector<1x1x128xf32>
    tpu.vector_store %arg5[%c0_13, %c0_14, %c0_15], %19 {strides = array<i32>} : memref<1x1x128xf32, #tpu.memory_space<vmem>>, vector<1x1x128xf32>,
    return
  }
  func.func @transform_0(%arg0: i32) -> (i32, i32, i32) {
    %c0_i32 = arith.constant 0 : i32
    %c0_i32_0 = arith.constant 0 : i32
    %c0_i32_1 = arith.constant 0 : i32
    return %arg0, %c0_i32, %c0_i32_0 : i32, i32, i32
  }
  func.func @transform_1(%arg0: i32) -> (i32, i32, i32) {
    %c0_i32 = arith.constant 0 : i32
    %c0_i32_0 = arith.constant 0 : i32
    %c0_i32_1 = arith.constant 0 : i32
    %c0_i32_2 = arith.constant 0 : i32
    return %c0_i32, %c0_i32_0, %c0_i32_1 : i32, i32, i32
  }
  func.func @transform_2(%arg0: i32) -> (i32, i32, i32) {
    %c0_i32 = arith.constant 0 : i32
    %c0_i32_0 = arith.constant 0 : i32
    %c0_i32_1 = arith.constant 0 : i32
    return %arg0, %c0_i32, %c0_i32_0 : i32, i32, i32
  }
  func.func @transform_3(%arg0: i32) -> (i32, i32, i32) {
    %c0_i32 = arith.constant 0 : i32
    %c0_i32_0 = arith.constant 0 : i32
    %c0_i32_1 = arith.constant 0 : i32
    return %arg0, %c0_i32, %c0_i32_0 : i32, i32, i32
  }
  func.func @transform_4(%arg0: i32) -> (i32, i32, i32) {
    %c0_i32 = arith.constant 0 : i32
    %c0_i32_0 = arith.constant 0 : i32
    %c0_i32_1 = arith.constant 0 : i32
    return %arg0, %c0_i32, %c0_i32_0 : i32, i32, i32
  }
}

</mosaic_0001>

<bundles_post_ra>
// kernel: tile.33
= control target key start
LH: loop header
LB: loop body
LE: loop exit
PB: predicated region body
PF: predicated region fallthrough
CT: control target
= control target key end

     0   :  { %s28_s0 = inlined_call_operand.vmem [shape: f32[8], index: 0, kind: input, shape index: {}]   ;;  %s29_s1 = inlined_call_operand.vmem [shape: f32[16,8], index: 1, kind: output, shape index: {}]  }
   0x1   :  { %v4_v0 = vld [vmem:[%s28_s0] ss:$0 sm:$0xff] }
   0x2   :  { %5 = vst [vmem:[%s29_s1] sm:$0xff] %v4_v0  ;;  %8 = vst [vmem:[%s29_s1 + $0x8] sm:$0xff] %v4_v0 }

// kernel: tile.34
= control target key start
LH: loop header
LB: loop body
LE: loop exit
PB: predicated region body
PF: predicated region fallthrough
CT: control target
= control target key end

     0   :  { %s133_s10 = smov 120   ;;  %s134_s11 = smov 104   ;;  %vm3_vm0 = vcmask 64512   ;;  %vm9_vm1 = vcmask 1048512   ;;  %vm15_vm2 = vcmask 982912   ;;  %vm21_vm3 = vcmask 917312   ;;  %s209_s0 = inlined_call_operand.vmem [shape: f32[16,8], index: 0, kind: input, shape index: {}]   ;;  %s210_s1 = inlined_call_operand.vmem [shape: f32[1,1,128], index: 1, kind: output, shape index: {}]  }
   0x1   :  { %v103_v0 = vld [vmem:[%s209_s0 + $0xf] sm:$0x1]   ;;  %v105_v1 = vld [vmem:[%s209_s0 + $0xd] sm:$0x1]   ;;  %v104_v2 = vld [vmem:[%s209_s0 + $0xe] sm:$0x1]  }
   0x2   :  { %7 = vrot.lane.b32.xlu0 %v103_v0, %s133_s10  ;;  %19 = vrot.lane.b32.xlu1 %v105_v1, %s134_s11  ;;  %v106_v3 = vld [vmem:[%s209_s0 + $0xc] sm:$0x1]   ;;  %s135_s16 = smov 112   ;;  %s136_s17 = smov 96   ;;  %v107_v4 = vld [vmem:[%s209_s0 + $0xb] sm:$0x1]  }
   0x3   :  { %v108_v5 = vld [vmem:[%s209_s0 + $0xa] sm:$0x1]   ;;  %v2_v6 = vld [vmem:[%s209_s0] sm:$0x1]   ;;  %s137_s24 = smov 88   ;;  %s138_s25 = smov 80  }
   0x4   :  { %4 = vst.msk [vmem:[#allocation0] sm:$0x1] %vm3_vm0, %v2_v6   ;;  %v109_v7 = vld [vmem:[%s209_s0 + $0x9] sm:$0x1]   ;;  %v110_v8 = vld [vmem:[%s209_s0 + $0x8] sm:$0x1]  }
   0x5   :  { %s139_s30 = smov 72   ;;  %s140_s2 = smov 64   ;;  %v111_v9 = vld [vmem:[%s209_s0 + $0x7] sm:$0x1]   ;;  %v112_v10 = vld [vmem:[%s209_s0 + $0x6] sm:$0x1]  }
   0x6   :  { %13 = vrot.lane.b32.xlu0 %v104_v2, %s135_s16  ;;  %25 = vrot.lane.b32.xlu1 %v106_v3, %s136_s17  ;;  %s141_s7 = smov 56   ;;  %s142_s8 = smov 48   ;;  %v113_v11 = vld [vmem:[%s209_s0 + $0x5] sm:$0x1]   ;;  %v114_v12 = vld [vmem:[%s209_s0 + $0x4] sm:$0x1]  }
   0x7   :  { %s143_s13 = smov 40   ;;  %s144_s14 = smov 32   ;;  %v115_v13 = vld [vmem:[%s209_s0 + $0x3] sm:$0x1]   ;;  %v116_v14 = vld [vmem:[%s209_s0 + $0x2] sm:$0x1]  }
   0x8   :  { %s145_s19 = smov 24   ;;  %s146_s20 = smov 16   ;;  %v117_v15 = vld [vmem:[%s209_s0 + $0x1] sm:$0x1]   ;;  %vm27_vm4 = vcmask 851712   ;;  %vm33_vm5 = vcmask 786112  }
   0x9   :  { %s147_s0 = smov 8   ;;  %vm39_vm6 = vcmask 720512   ;;  %vm45_vm7 = vcmask 654912   ;;  %vm51_vm8 = vcmask 589312   ;;  %vm57_vm9 = vcmask 523712  }
   0xa   :  { %31 = vrot.lane.b32.xlu0 %v107_v4, %s137_s24  ;;  %37 = vrot.lane.b32.xlu1 %v108_v5, %s138_s25  ;;  %vm63_vm10 = vcmask 458112   ;;  %vm69_vm11 = vcmask 392512   ;;  %vm75_vm12 = vcmask 326912   ;;  %vm81_vm13 = vcmask 261312  }
   0xb   :  { %vm87_vm14 = vcmask 195712   ;;  %vm93_vm15 = vcmask 130112  }
   0xe   :  { %43 = vrot.lane.b32.xlu0 %v109_v7, %s139_s30  ;;  %49 = vrot.lane.b32.xlu1 %v110_v8, %s140_s2 }
  0x12   :  { %55 = vrot.lane.b32.xlu0 %v111_v9, %s141_s7  ;;  %61 = vrot.lane.b32.xlu1 %v112_v10, %s142_s8 }
  0x16   :  { %67 = vrot.lane.b32.xlu0 %v113_v11, %s143_s13  ;;  %73 = vrot.lane.b32.xlu1 %v114_v12, %s144_s14 }
  0x1a   :  { %79 = vrot.lane.b32.xlu0 %v115_v13, %s145_s19  ;;  %85 = vrot.lane.b32.xlu1 %v116_v14, %s146_s20 }
  0x1e   :  { %91 = vrot.lane.b32.xlu0 %v117_v15, %s147_s0 }
  0x74   :  { %v8_v16 = vpop.permute.xlu0 %7   ;;  %v20_v17 = vpop.permute.xlu1 %19  }
  0x75   :  { %10 = vst.msk [vmem:[#allocation0] sm:$0x1] %vm9_vm1, %v8_v16  }
  0x78   :  { %v14_v18 = vpop.permute.xlu0 %13   ;;  %v26_v19 = vpop.permute.xlu1 %25  }
  0x79   :  { %16 = vst.msk [vmem:[#allocation0] sm:$0x1] %vm15_vm2, %v14_v18  }
  0x7a   :  { %22 = vst.msk [vmem:[#allocation0] sm:$0x1] %vm21_vm3, %v20_v17  }
  0x7b   :  { %28 = vst.msk [vmem:[#allocation0] sm:$0x1] %vm27_vm4, %v26_v19  }
  0x7c   :  { %v32_v20 = vpop.permute.xlu0 %31   ;;  %v38_v21 = vpop.permute.xlu1 %37  }
  0x7d   :  { %34 = vst.msk [vmem:[#allocation0] sm:$0x1] %vm33_vm5, %v32_v20  }
  0x7e   :  { %40 = vst.msk [vmem:[#allocation0] sm:$0x1] %vm39_vm6, %v38_v21  }
  0x80   :  { %v44_v22 = vpop.permute.xlu0 %43   ;;  %v50_v23 = vpop.permute.xlu1 %49  }
  0x81   :  { %46 = vst.msk [vmem:[#allocation0] sm:$0x1] %vm45_vm7, %v44_v22  }
  0x82   :  { %52 = vst.msk [vmem:[#allocation0] sm:$0x1] %vm51_vm8, %v50_v23  }
  0x84   :  { %v56_v24 = vpop.permute.xlu0 %55   ;;  %v62_v25 = vpop.permute.xlu1 %61  }
  0x85   :  { %58 = vst.msk [vmem:[#allocation0] sm:$0x1] %vm57_vm9, %v56_v24  }
  0x86   :  { %64 = vst.msk [vmem:[#allocation0] sm:$0x1] %vm63_vm10, %v62_v25  }
  0x88   :  { %v68_v26 = vpop.permute.xlu0 %67   ;;  %v74_v27 = vpop.permute.xlu1 %73  }
  0x89   :  { %70 = vst.msk [vmem:[#allocation0] sm:$0x1] %vm69_vm11, %v68_v26  }
  0x8a   :  { %76 = vst.msk [vmem:[#allocation0] sm:$0x1] %vm75_vm12, %v74_v27  }
  0x8c   :  { %v80_v28 = vpop.permute.xlu0 %79   ;;  %v86_v29 = vpop.permute.xlu1 %85  }
  0x8d   :  { %82 = vst.msk [vmem:[#allocation0] sm:$0x1] %vm81_vm13, %v80_v28  }
  0x8e   :  { %88 = vst.msk [vmem:[#allocation0] sm:$0x1] %vm87_vm14, %v86_v29  }
  0x90   :  { %v92_v30 = vpop.permute.xlu0 %91  }
  0x91   :  { %94 = vst.msk [vmem:[#allocation0] sm:$0x1] %vm93_vm15, %v92_v30  }
  0x98   :  { %v99_v31 = vld [vmem:[#allocation0] sm:$0x1] }
  0x99   :  { %102 = vst [vmem:[%s210_s1] sm:$0x1] %v99_v31 }

// kernel: resnet_block_forward.6
= control target key start
LH: loop header
LB: loop body
LE: loop exit
PB: predicated region body
PF: predicated region fallthrough
CT: control target
= control target key end

     0   :  { %s324_s12 = smov 0   ;;  %s341_s0 = inlined_call_operand.vmem [shape: bf16[2,16,128], index: 0, kind: input, shape index: {}]   ;;  %s342_s1 = inlined_call_operand.vmem [shape: f32[1,1,128], index: 1, kind: input, shape index: {}]   ;;  %s343_s2 = inlined_call_operand.vmem [shape: f32[1,1,128], index: 2, kind: input, shape index: {}]   ;;  %s344_s3 = inlined_call_operand.vmem [shape: bf16[2,16,128], index: 3, kind: output, shape index: {}]  }
   0x1 LB: > { %s260_s13 = sadd.s32 4294967295, %s302_s12   ;;  %p264_p0 = scmp.ge.s32.totalorder %s302_s12, 1  ;;  %s302_s12 = sphi %s324_s12, %s13_s12  }
   0x2   : > { %p137_p1 = scmp.lt.s32.totalorder %s302_s12, 3 }
   0x4   : > { %p138_p2 = pnand %p264_p0, %p137_p1 }
   0x5   : > { %p161_p3 = scmp.lt.s32.totalorder (!%p138_p2), %s260_s13, 1 }
   0x6   : > { %141 = sbr.rel (%p138_p2) target bundleno = 26 (0x1a), region = 32 }
   0xb   : > { %s346_s13 = smov (!%p161_p3, %s260_s13), 1  ;;  %v269_v1 = vld [vmem:[%s342_s1] ss:$0 sm:$0xff] }
   0xc   : > { %s275_s14 = sshll.u32 %s346_s13, 3  ;;  %v270_v4 = vld [vmem:[%s343_s2] ss:$0 sm:$0xff] }
   0xd   : > { %s165_s17 = scalar_lea.vmem %s341_s0, %s275_s14  ;;  %s170_s24 = scalar_lea.vmem %s344_s3, %s275_s14 }
   0xe   : > { %v280_v0 = vld [vmem:[%s165_s17] sm:$0xff]  }
   0xf   : > { %v281_v2 = vunpack.c.l.bf16 %v280_v0  ;;  %v282_v3 = vunpack.c.h.bf16 %v280_v0 }
  0x11   : > { %v182_v5 = vmul.f32 %v281_v2, %v269_v1  ;;  %v183_v6 = vmul.f32 %v282_v3, %v269_v1 }
  0x13   : > { %v191_v7 = vadd.f32 %v270_v4, %v182_v5  ;;  %v192_v8 = vadd.f32 %v270_v4, %v183_v6 }
  0x15   : > { %v193_v9 = vmax.f32 %v191_v7, 0.0  ;;  %v194_v10 = vmax.f32 %v192_v8, 0.0 }
  0x17   : > { %v286_v11 = vpack.c.bf16 %v194_v10, %v193_v9 }
  0x19   : > { %287 = vst [vmem:[%s170_s24] sm:$0xff] %v286_v11  }
  0x1a PF: > { %s13_s12 = sadd.s32 1, %s302_s12  }
  0x1b   : > { %p10_p4 = scmp.ge.s32.totalorder %s13_s12, 4  }
  0x1d   :  { %12 = sbr.rel (!%p10_p4) target bundleno = 1 (0x1), region = 62 }

// kernel: resnet_block_forward.5
= control target key start
LH: loop header
LB: loop body
LE: loop exit
PB: predicated region body
PF: predicated region fallthrough
CT: control target
= control target key end

     0   :  { %s818_s15 = smov 0   ;;  %s925_s0 = inlined_call_operand.vmem [shape: bf16[2,18,72], index: 0, kind: input, shape index: {}]   ;;  %s926_s1 = inlined_call_operand.vmem [shape: bf16[3,72,128], index: 1, kind: input, shape index: {}]   ;;  %s927_s2 = inlined_call_operand.vmem [shape: bf16[2,16,128], index: 2, kind: output, shape index: {0}]   ;;  %s928_s3 = inlined_call_operand.vmem [shape: f32[2,1,128], index: 3, kind: output, shape index: {1}]   ;;  %s929_s4 = inlined_call_operand.vmem [shape: f32[2,1,128], index: 4, kind: output, shape index: {2}]  }
   0x1 LB: > { %s635_s16 = sadd.s32 4294967295, %s789_s15   ;;  %p639_p0 = scmp.ge.s32.totalorder %s789_s15, 1  ;;  %s789_s15 = sphi %s818_s15, %s15_s15  }
   0x2   : > { %p167_p1 = scmp.lt.s32.totalorder %s789_s15, 3 }
   0x4   : > { %p168_p2 = pnand %p639_p0, %p167_p1 }
   0x5   : > { %p199_p3 = scmp.lt.s32.totalorder (!%p168_p2), %s635_s16, 1 }
   0x6   : > { %171 = sbr.rel (%p168_p2) target bundleno = 268 (0x10c), region = 28 }
   0xb   : > { %v765_v0 = vld [vmem:[%s926_s1 + $0x44] ss:$0 sps:$4 sm:$0xff]   ;;  %vm290_vm0 = vcmask 1043456   ;;  %v791_v1 = vmov 0.0   ;;  %v766_v2 = vld [vmem:[%s926_s1 + $0x20] ss:$0 sps:$4 sm:$0xff]  }
   0xc   : > { %712 = vmatprep.subr.bf16.mxu0 %v791_v1  ;;  %726 = vmatprep.subr.bf16.mxu1 %v791_v1  ;;  %v292_v3 = vsel %vm290_vm0, %v765_v0, 0  ;;  %v365_v4 = vsel %vm290_vm0, %v766_v2, 0  ;;  %v767_v5 = vld [vmem:[%s926_s1 + $0x3c] sm:$0xff]   ;;  %vm792_vm1 = vmmov 0   ;;  %v769_v7 = vld [vmem:[%s926_s1 + $0x34] sm:$0xff]   ;;  %s931_s16 = smov (!%p199_p3, %s635_s16), 1 }
   0xd   : > { %713 = vmatpush3.bf16.msra.mxu0 %v292_v3  ;;  %727 = vmatpush3.bf16.msra.mxu1 %v365_v4  ;;  %v768_v6 = vld [vmem:[%s926_s1 + $0x18] sm:$0xff]   ;;  %v770_v8 = vld [vmem:[%s926_s1 + $0x10] sm:$0xff]   ;;  %s754_s29 = smul.u32 12, %s931_s16  ;;  %v772_v10 = vld [vmem:[%s926_s1 + $0x8] sm:$0xff]   ;;  %vm246_vm2 = vsmask.f32 7424  ;;  %s211_s7 = scalar_lea.vmem %s928_s3, %s931_s16 }
   0xe   : > { %714 = vmatprep.subr.bf16.mxu0 %v791_v1  ;;  %728 = vmatprep.subr.bf16.mxu1 %v791_v1  ;;  %v771_v9 = vld [vmem:[%s926_s1 + $0x2c] sm:$0xff]   ;;  %v773_v15 = vld [vmem:[%s926_s1 + $0x24] sm:$0xff]   ;;  %vm286_vm3 = vcmask 588800   ;;  %v779_v27 = vld [vmem:[%s926_s1 + $0x58] sm:$0xff]   ;;  %vm422_vm4 = vcmask 1046528   ;;  %s686_s27 = sshll.u32 %s931_s16, 3 }
   0xf   : > { %722 = vmatprep.mubr.msk.bf16.mxu0 %vm792_vm1, %v791_v1  ;;  %736 = vmatprep.mubr.msk.bf16.mxu1 %vm792_vm1, %v791_v1  ;;  %s868_s10 = scalar_lea.vmem %s925_s0, %s754_s29  ;;  %v774_v19 = vld [vmem:[%s926_s1] sm:$0xff]   ;;  %v777_v20 = vld [vmem:[%s926_s1 + $0x68] ss:$0 sps:$4 sm:$0xff]   ;;  %v780_v29 = vld [vmem:[%s926_s1 + $0x50] sm:$0xff]   ;;  %s208_s30 = scalar_lea.vmem %s927_s2, %s686_s27 }
  0x10   : > { %v216_v11 = vld [vmem:[%s868_s10] sm:$0xf]  ;;  %v217_v12 = vld [vmem:[%s868_s10 + $0x4] sm:$0xf]  ;;  %v457_v24 = vsel %vm290_vm0, %v777_v20, 0  ;;  %v781_v31 = vld [vmem:[%s926_s1 + $0x48] sm:$0xff]  }
  0x11   : > { %715 = vmatpush3.bf16.msra.mxu0 %v767_v5  ;;  %729 = vmatpush3.bf16.msra.mxu1 %v768_v6  ;;  %v652_v13 = vcombine.low %v216_v11, %v217_v12  ;;  %v776_v14 = vld [vmem:[%s868_s10 + $0x8] ss:$0 sps:$4 sm:$0x11]   ;;  %v778_v26 = vld [vmem:[%s926_s1 + $0x60] sm:$0xff]  }
  0x12   : > { %716 = vmatprep.subr.bf16.mxu0 %v791_v1  ;;  %730 = vmatprep.subr.bf16.mxu1 %v791_v1  ;;  %v255_v18 = vshll.u32 %v776_v14, 16  ;;  %v408_v28 = vld [vmem:[%s868_s10] sm:$0xe]  ;;  %v424_v33 = vrot.slane %v776_v14, 1  ;;  %s214_s10 = scalar_lea.vmem %s929_s4, %s931_s16 }
  0x13   : > { %v248_v16 = vshrl.u32 %v652_v13, 16  ;;  %v250_v17 = vshll.u32 %v652_v13, 16  ;;  %v675_v30 = vcombine.low %v408_v28, %v217_v12 }
  0x14   : > { %v257_v22 = vrot.slane %v255_v18, 1 }
  0x15   : > { %717 = vmatpush3.bf16.msra.mxu0 %v769_v7  ;;  %731 = vmatpush3.bf16.msra.mxu1 %v770_v8  ;;  %v252_v21 = vrot.slane %v250_v17, 1  ;;  %v423_v32 = vrot.slane %v675_v30, 1 }
  0x16   : > { %718 = vmatprep.subr.bf16.mxu0 %v791_v1  ;;  %732 = vmatprep.subr.bf16.mxu1 %v791_v1 }
  0x17   : > { %v253_v23 = vor.u32 %v252_v21, %v248_v16  ;;  %v425_v34 = vsel %vm422_vm4, %v423_v32, %v424_v33 }
  0x19   : > { %719 = vmatpush3.bf16.msra.mxu0 %v771_v9  ;;  %733 = vmatpush3.bf16.msra.mxu1 %v772_v10  ;;  %v258_v25 = vsel %vm246_vm2, %v253_v23, %v257_v22 }
  0x1a   : > { %720 = vmatprep.subr.bf16.mxu0 %v791_v1  ;;  %734 = vmatprep.subr.bf16.mxu1 %v791_v1 }
  0x1d   : > { %721 = vmatpush3.bf16.msra.mxu0 %v773_v15  ;;  %735 = vmatpush3.bf16.msra.mxu1 %v774_v19 }
  0x1e   : > { %740 = vmatprep.subr.bf16.mxu0 %v791_v1 }
  0x20   : > { %723 = vmatmul.mubr.msk.bf16.vlgmr.msra.gmra.mxu0 %vm286_vm3, %v258_v25  ;;  %737 = vmatmul.mubr.msk.bf16.vlgmr.msra.gmra.mxu1 %vm286_vm3, %v652_v13 }
  0x21   : > { %741 = vmatpush3.bf16.msra.mxu0 %v457_v24  ;;  %750 = vmatprep.mubr.msk.bf16.mxu0 %vm792_vm1, %v791_v1 }
  0x22   : > { %742 = vmatprep.subr.bf16.mxu0 %v791_v1 }
  0x25   : > { %743 = vmatpush3.bf16.msra.mxu0 %v778_v26 }
  0x26   : > { %744 = vmatprep.subr.bf16.mxu0 %v791_v1 }
  0x29   : > { %745 = vmatpush3.bf16.msra.mxu0 %v779_v27 }
  0x2a   : > { %746 = vmatprep.subr.bf16.mxu0 %v791_v1 }
  0x2d   : > { %747 = vmatpush3.bf16.msra.mxu0 %v780_v29 }
  0x2e   : > { %748 = vmatprep.subr.bf16.mxu0 %v791_v1 }
  0x31   : > { %749 = vmatpush3.bf16.msra.mxu0 %v781_v31 }
  0x34   : > { %751 = vmatmul.mubr.msk.bf16.vlgmr.msra.gmra.mxu0 %vm286_vm3, %v425_v34 }
  0xe0   : > { %v328_v35 = vpop.f32.mrf.mxu0  ;;  %v401_v36 = vpop.f32.mrf.mxu1 }
  0xe1   : > { %v402_v44 = vadd.f32 %v401_v36, %v328_v35 }
  0xe2   : > { %v724_v37 = vpop.f32.mrf.mxu0  ;;  %v738_v38 = vpop.f32.mrf.mxu1 }
  0xe4   : > { %v331_v39 = vpop.f32.mrf.mxu0  ;;  %v404_v40 = vpop.f32.mrf.mxu1 }
  0xe5   : > { %v405_v46 = vadd.f32 %v404_v40, %v331_v39 }
  0xe6   : > { %v725_v41 = vpop.f32.mrf.mxu0  ;;  %v739_v42 = vpop.f32.mrf.mxu1 }
  0xf4   : > { %v493_v43 = vpop.f32.mrf.mxu0 }
  0xf5   : > { %v500_v47 = vadd.f32 %v493_v43, %v402_v44 }
  0xf6   : > { %v752_v45 = vpop.f32.mrf.mxu0 }
  0xf7   : > { %v520_v51 = vmul.f32 %v500_v47, %v500_v47 }
  0xf8   : > { %v496_v48 = vpop.f32.mrf.mxu0 }
  0xf9   : > { %v501_v49 = vadd.f32 %v496_v48, %v405_v46 }
  0xfa   : > { %v753_v50 = vpop.f32.mrf.mxu0 }
  0xfb   : > { %v692_v52 = vpack.c.bf16 %v501_v49, %v500_v47  ;;  %v512_v53 = vadd.f32 %v501_v49, %v500_v47  ;;  %v521_v54 = vmul.f32 %v501_v49, %v501_v49 }
  0xfd   : > { %693 = vst [vmem:[%s208_s30] sm:$0xff] %v692_v52   ;;  %v513_v55 = vrot.slane %v512_v53, 4  ;;  %v522_v56 = vadd.f32 %v521_v54, %v520_v51 }
  0xff   : > { %v514_v57 = vadd.f32 %v513_v55, %v512_v53  ;;  %v523_v58 = vrot.slane %v522_v56, 4 }
 0x101   : > { %v515_v59 = vrot.slane %v514_v57, 2  ;;  %v524_v60 = vadd.f32 %v523_v58, %v522_v56 }
 0x103   : > { %v516_v61 = vadd.f32 %v515_v59, %v514_v57  ;;  %v525_v62 = vrot.slane %v524_v60, 2 }
 0x105   : > { %v517_v63 = vrot.slane %v516_v61, 1  ;;  %v526_v0 = vadd.f32 %v525_v62, %v524_v60 }
 0x107   : > { %v518_v1 = vadd.f32 %v517_v63, %v516_v61  ;;  %v527_v2 = vrot.slane %v526_v0, 1 }
 0x109   : > { %519 = vst [vmem:[%s211_s7] sm:$0x1] %v518_v1  ;;  %v528_v3 = vadd.f32 %v527_v2, %v526_v0 }
 0x10b   : > { %529 = vst [vmem:[%s214_s10] sm:$0x1] %v528_v3 }
 0x10c PF: > { %s15_s15 = sadd.s32 1, %s789_s15  }
 0x10d   : > { %p12_p4 = scmp.ge.s32.totalorder %s15_s15, 4  }
 0x10f   :  { %14 = sbr.rel (!%p12_p4) target bundleno = 1 (0x1), region = 84 }

// kernel: resnet_block_forward.9
= control target key start
LH: loop header
LB: loop body
LE: loop exit
PB: predicated region body
PF: predicated region fallthrough
CT: control target
= control target key end

     0   :  { %s468_s21 = smov 0   ;;  %s500_s0 = inlined_call_operand.vmem [shape: bf16[2,16,128], index: 0, kind: input, shape index: {}]   ;;  %s501_s1 = inlined_call_operand.vmem [shape: f32[1,1,128], index: 1, kind: input, shape index: {}]   ;;  %s502_s2 = inlined_call_operand.vmem [shape: f32[1,1,128], index: 2, kind: input, shape index: {}]   ;;  %s503_s3 = inlined_call_operand.vmem [shape: bf16[2,16,128], index: 3, kind: input, shape index: {}]   ;;  %s504_s4 = inlined_call_operand.vmem [shape: f32[1,1,128], index: 4, kind: input, shape index: {}]   ;;  %s505_s5 = inlined_call_operand.vmem [shape: f32[1,1,128], index: 5, kind: input, shape index: {}]   ;;  %s506_s6 = inlined_call_operand.vmem [shape: f32[2,16,128], index: 6, kind: output, shape index: {}]  }
   0x1 LB: > { %s389_s22 = sadd.s32 4294967295, %s431_s21   ;;  %p393_p0 = scmp.ge.s32.totalorder %s431_s21, 1  ;;  %s431_s21 = sphi %s468_s21, %s16_s21  }
   0x2   : > { %p222_p1 = scmp.lt.s32.totalorder %s431_s21, 3 }
   0x4   : > { %p223_p2 = pnand %p393_p0, %p222_p1 }
   0x5   : > { %p257_p3 = scmp.lt.s32.totalorder (!%p223_p2), %s389_s22, 1 }
   0x6   : > { %226 = sbr.rel (%p223_p2) target bundleno = 28 (0x1c), region = 44 }
   0xb   : > { %s508_s22 = smov (!%p257_p3, %s389_s22), 1  ;;  %v400_v0 = vld [vmem:[%s501_s1] ss:$0 sm:$0xff] }
   0xc   : > { %s406_s23 = sshll.u32 %s508_s22, 3  ;;  %v402_v3 = vld [vmem:[%s504_s4] ss:$0 sm:$0xff]  ;;  %s408_s14 = sshll.u32 %s508_s22, 4 }
   0xd   : > { %s261_s26 = scalar_lea.vmem %s500_s0, %s406_s23  ;;  %s266_s29 = scalar_lea.vmem %s503_s3, %s406_s23  ;;  %v401_v8 = vld [vmem:[%s502_s2] ss:$0 sm:$0xff] }
   0xe   : > { %v410_v1 = vld [vmem:[%s261_s26] sm:$0xff]   ;;  %s271_s17 = scalar_lea.vmem %s506_s6, %s408_s14 }
   0xf   : > { %v414_v2 = vld [vmem:[%s266_s29] sm:$0xff]   ;;  %v411_v4 = vunpack.c.l.bf16 %v410_v1  ;;  %v412_v5 = vunpack.c.h.bf16 %v410_v1 }
  0x10   : > { %v415_v6 = vunpack.c.l.bf16 %v414_v2  ;;  %v416_v7 = vunpack.c.h.bf16 %v414_v2  ;;  %v403_v15 = vld [vmem:[%s505_s5] ss:$0 sm:$0xff] }
  0x11   : > { %v283_v9 = vmul.f32 %v411_v4, %v400_v0  ;;  %v284_v11 = vmul.f32 %v412_v5, %v400_v0 }
  0x12   : > { %v305_v10 = vmul.f32 %v415_v6, %v402_v3  ;;  %v306_v12 = vmul.f32 %v416_v7, %v402_v3 }
  0x13   : > { %v292_v13 = vadd.f32 %v401_v8, %v283_v9  ;;  %v293_v14 = vadd.f32 %v401_v8, %v284_v11 }
  0x15   : > { %v307_v16 = vadd.f32 %v305_v10, %v292_v13  ;;  %v308_v17 = vadd.f32 %v306_v12, %v293_v14 }
  0x17   : > { %v316_v18 = vadd.f32 %v403_v15, %v307_v16  ;;  %v317_v19 = vadd.f32 %v403_v15, %v308_v17 }
  0x19   : > { %v318_v20 = vmax.f32 %v316_v18, 0.0  ;;  %v319_v21 = vmax.f32 %v317_v19, 0.0 }
  0x1b   : > { %320 = vst [vmem:[%s271_s17] sm:$0xff] %v318_v20  ;;  %321 = vst [vmem:[%s271_s17 + $0x8] sm:$0xff] %v319_v21 }
  0x1c PF: > { %s16_s21 = sadd.s32 1, %s431_s21  }
  0x1d   : > { %p13_p4 = scmp.ge.s32.totalorder %s16_s21, 4  }
  0x1f   :  { %15 = sbr.rel (!%p13_p4) target bundleno = 1 (0x1), region = 77 }

// kernel: resnet_block_forward.7
= control target key start
LH: loop header
LB: loop body
LE: loop exit
PB: predicated region body
PF: predicated region fallthrough
CT: control target
= control target key end

     0   :  { %s927_s15 = smov 0   ;;  %s1087_s0 = inlined_call_operand.vmem [shape: bf16[2,18,144], index: 0, kind: input, shape index: {}]   ;;  %s1088_s1 = inlined_call_operand.vmem [shape: bf16[3,144,128], index: 1, kind: input, shape index: {}]   ;;  %s1089_s2 = inlined_call_operand.vmem [shape: bf16[2,16,128], index: 2, kind: output, shape index: {0}]   ;;  %s1090_s3 = inlined_call_operand.vmem [shape: f32[2,1,128], index: 3, kind: output, shape index: {1}]   ;;  %s1091_s4 = inlined_call_operand.vmem [shape: f32[2,1,128], index: 4, kind: output, shape index: {2}]  }
   0x1 LB: > { %s758_s16 = sadd.s32 4294967295, %s899_s15   ;;  %p762_p0 = scmp.ge.s32.totalorder %s899_s15, 1  ;;  %s899_s15 = sphi %s927_s15, %s15_s15  }
   0x2   : > { %p167_p1 = scmp.lt.s32.totalorder %s899_s15, 3 }
   0x4   : > { %p168_p2 = pnand %p762_p0, %p167_p1 }
   0x5   : > { %p199_p3 = scmp.lt.s32.totalorder (!%p168_p2), %s758_s16, 1 }
   0x6   : > { %171 = sbr.rel (%p168_p2) target bundleno = 300 (0x12c), region = 28 }
   0xb   : > { %v860_v0 = vld [vmem:[%s1088_s1 + $0x80] sm:$0xff]   ;;  %v901_v1 = vmov 0   ;;  %v861_v2 = vld [vmem:[%s1088_s1 + $0x38] sm:$0xff]   ;;  %v863_v4 = vld [vmem:[%s1088_s1 + $0x30] sm:$0xff]   ;;  %s1093_s16 = smov (!%p199_p3, %s758_s16), 1  ;;  %vm349_vm0 = vcmask 130048  }
   0xc   : > { %353 = vmatprep.subr.bf16.mxu0 %v901_v1  ;;  %451 = vmatprep.subr.bf16.mxu1 %v901_v1  ;;  %v862_v3 = vld [vmem:[%s1088_s1 + $0x78] sm:$0xff]   ;;  %v864_v5 = vld [vmem:[%s1088_s1 + $0x70] sm:$0xff]   ;;  %v865_v6 = vld [vmem:[%s1088_s1 + $0x28] sm:$0xff]   ;;  %s850_s7 = smul.u32 24, %s1093_s16  ;;  %vm269_vm1 = vsmask.f32 7424  ;;  %s214_s10 = scalar_lea.vmem %s1091_s4, %s1093_s16 }
   0xd   : > { %354 = vmatpush1.bf16.msra.mxu0 %v860_v0  ;;  %452 = vmatpush1.bf16.msra.mxu1 %v861_v2  ;;  %v866_v7 = vld [vmem:[%s1088_s1 + $0x68] sm:$0xff]   ;;  %v867_v8 = vld [vmem:[%s1088_s1 + $0x20] sm:$0xff]   ;;  %v869_v10 = vld [vmem:[%s1088_s1 + $0x18] sm:$0xff]   ;;  %vm517_vm2 = vcmask 1046528   ;;  %s842_s27 = sshll.u32 %s1093_s16, 3 }
   0xe   : > { %355 = vmatprep.subr.bf16.mxu0 %v901_v1  ;;  %453 = vmatprep.subr.bf16.mxu1 %v901_v1  ;;  %v868_v9 = vld [vmem:[%s1088_s1 + $0x60] sm:$0xff]   ;;  %s980_s14 = scalar_lea.vmem %s1087_s0, %s850_s7  ;;  %v870_v11 = vld [vmem:[%s1088_s1 + $0x58] sm:$0xff]   ;;  %v871_v15 = vld [vmem:[%s1088_s1 + $0x10] sm:$0xff]   ;;  %s208_s30 = scalar_lea.vmem %s1089_s2, %s842_s27 }
   0xf   : > { %v216_v12 = vld [vmem:[%s980_s14] sm:$0xff]  ;;  %v988_v13 = vld [vmem:[%s980_s14 + $0x8] sm:$0xff]  ;;  %v236_v14 = vld [vmem:[%s980_s14 + $0x10] sm:$0x11]  ;;  %s211_s7 = scalar_lea.vmem %s1090_s3, %s1093_s16 }
  0x10   : > { %v785_v16 = vcombine.high %v216_v12, %v988_v13  ;;  %v787_v17 = vcombine.high %v236_v14, %v236_v14  ;;  %v784_v18 = vcombine.low %v216_v12, %v988_v13  ;;  %v872_v22 = vld [vmem:[%s1088_s1 + $0x50] sm:$0xff]   ;;  %v873_v23 = vld [vmem:[%s1088_s1 + $0x8] sm:$0xff]   ;;  %v1005_v24 = vcombine.low %v236_v14, %v236_v14  ;;  %v875_v33 = vld [vmem:[%s1088_s1] sm:$0xff]  }
  0x11   : > { %356 = vmatpush1.bf16.msra.mxu0 %v862_v3  ;;  %454 = vmatpush1.bf16.msra.mxu1 %v863_v4  ;;  %v874_v28 = vld [vmem:[%s1088_s1 + $0x48] sm:$0xff]   ;;  %v492_v35 = vld [vmem:[%s980_s14] sm:$0xee]  ;;  %v884_v47 = vld [vmem:[%s1088_s1 + $0xb8] sm:$0xff]  }
  0x12   : > { %357 = vmatprep.subr.bf16.mxu0 %v901_v1  ;;  %455 = vmatprep.subr.bf16.mxu1 %v901_v1  ;;  %v283_v19 = vshrl.u32 %v785_v16, 16  ;;  %v285_v20 = vshll.u32 %v785_v16, 16  ;;  %v290_v21 = vshll.u32 %v787_v17, 16  ;;  %v273_v25 = vshll.u32 %v784_v18, 16  ;;  %v876_v36 = vld [vmem:[%s1088_s1 + $0x88] sm:$0xff]   ;;  %v877_v40 = vld [vmem:[%s1088_s1 + $0x40] sm:$0xff]  }
  0x13   : > { %807 = vmatprep.mubr.msk.bf16.mxu1 %vm349_vm0, %v785_v16  ;;  %v271_v30 = vshrl.u32 %v784_v18, 16  ;;  %v278_v32 = vshll.u32 %v1005_v24, 16  ;;  %v827_v39 = vcombine.high %v492_v35, %v988_v13  ;;  %v522_v42 = vrot.slane %v787_v17, 1  ;;  %v882_v44 = vld [vmem:[%s1088_s1 + $0xc8] sm:$0xff]   ;;  %v883_v46 = vld [vmem:[%s1088_s1 + $0xc0] sm:$0xff]   ;;  %v885_v48 = vld [vmem:[%s1088_s1 + $0xb0] sm:$0xff]  }
  0x14   : > { %v287_v26 = vrot.slane %v285_v20, 1  ;;  %v292_v27 = vrot.slane %v290_v21, 1  ;;  %v275_v31 = vrot.slane %v273_v25, 1  ;;  %v886_v49 = vld [vmem:[%s1088_s1 + $0xa8] sm:$0xff]   ;;  %v887_v50 = vld [vmem:[%s1088_s1 + $0xa0] sm:$0xff]   ;;  %v888_v51 = vld [vmem:[%s1088_s1 + $0x98] sm:$0xff]   ;;  %v826_v53 = vcombine.low %v492_v35, %v988_v13 }
  0x15   : > { %358 = vmatpush1.bf16.msra.mxu0 %v864_v5  ;;  %456 = vmatpush1.bf16.msra.mxu1 %v865_v6  ;;  %v280_v38 = vrot.slane %v278_v32, 1  ;;  %v521_v41 = vrot.slane %v827_v39, 1  ;;  %v889_v52 = vld [vmem:[%s1088_s1 + $0x90] sm:$0xff]   ;;  %v519_v56 = vrot.slane %v1005_v24, 1 }
  0x16   : > { %359 = vmatprep.subr.bf16.mxu0 %v901_v1  ;;  %457 = vmatprep.subr.bf16.mxu1 %v901_v1  ;;  %v288_v29 = vor.u32 %v287_v26, %v283_v19  ;;  %v276_v37 = vor.u32 %v275_v31, %v271_v30  ;;  %v890_v54 = vld [vmem:[%s1088_s1 + $0xd0] sm:$0xff]   ;;  %v518_v55 = vrot.slane %v826_v53, 1 }
  0x17   : > { %v523_v45 = vsel %vm517_vm2, %v521_v41, %v522_v42 }
  0x18   : > { %v293_v34 = vsel %vm269_vm1, %v288_v29, %v292_v27  ;;  %v281_v43 = vsel %vm269_vm1, %v276_v37, %v280_v38  ;;  %v520_v57 = vsel %vm517_vm2, %v518_v55, %v519_v56 }
  0x19   : > { %360 = vmatpush1.bf16.msra.mxu0 %v866_v7  ;;  %458 = vmatpush1.bf16.msra.mxu1 %v867_v8 }
  0x1a   : > { %361 = vmatprep.subr.bf16.mxu0 %v901_v1  ;;  %459 = vmatprep.subr.bf16.mxu1 %v901_v1 }
  0x1b   : > { %797 = vmatprep.mubr.msk.bf16.mxu0 %vm349_vm0, %v293_v34 }
  0x1d   : > { %362 = vmatpush1.bf16.msra.mxu0 %v868_v9  ;;  %460 = vmatpush1.bf16.msra.mxu1 %v869_v10 }
  0x1e   : > { %363 = vmatprep.subr.bf16.mxu0 %v901_v1  ;;  %461 = vmatprep.subr.bf16.mxu1 %v901_v1 }
  0x21   : > { %364 = vmatpush1.bf16.msra.mxu0 %v870_v11  ;;  %462 = vmatpush1.bf16.msra.mxu1 %v871_v15 }
  0x22   : > { %365 = vmatprep.subr.bf16.mxu0 %v901_v1  ;;  %463 = vmatprep.subr.bf16.mxu1 %v901_v1 }
  0x25   : > { %366 = vmatpush1.bf16.msra.mxu0 %v872_v22  ;;  %464 = vmatpush1.bf16.msra.mxu1 %v873_v23 }
  0x26   : > { %367 = vmatprep.subr.bf16.mxu0 %v901_v1  ;;  %465 = vmatprep.subr.bf16.mxu1 %v901_v1 }
  0x29   : > { %368 = vmatpush1.bf16.msra.mxu0 %v874_v28  ;;  %466 = vmatpush1.bf16.msra.mxu1 %v875_v33 }
  0x2a   : > { %383 = vmatprep.subr.bf16.mxu0 %v901_v1  ;;  %481 = vmatprep.subr.bf16.mxu1 %v901_v1 }
  0x2d   : > { %384 = vmatpush2.bf16.msra.mxu0 %v876_v36  ;;  %482 = vmatpush2.bf16.msra.mxu1 %v877_v40 }
  0x2e   : > { %582 = vmatprep.subr.bf16.mxu0 %v901_v1 }
  0x30   : > { %386 = vmatmul.mubr.bf16.vlgmr.msra.gmra.mxu0 %v281_v43  ;;  %484 = vmatmul.mubr.bf16.vlgmr.msra.gmra.mxu1 %v784_v18 }
  0x31   : > { %583 = vmatpush1.bf16.msra.mxu0 %v882_v44  ;;  %837 = vmatprep.mubr.msk.bf16.mxu0 %vm349_vm0, %v523_v45 }
  0x32   : > { %584 = vmatprep.subr.bf16.mxu0 %v901_v1 }
  0x35   : > { %585 = vmatpush1.bf16.msra.mxu0 %v883_v46 }
  0x36   : > { %586 = vmatprep.subr.bf16.mxu0 %v901_v1 }
  0x39   : > { %587 = vmatpush1.bf16.msra.mxu0 %v884_v47 }
  0x3a   : > { %588 = vmatprep.subr.bf16.mxu0 %v901_v1 }
  0x3d   : > { %589 = vmatpush1.bf16.msra.mxu0 %v885_v48 }
  0x3e   : > { %590 = vmatprep.subr.bf16.mxu0 %v901_v1 }
  0x41   : > { %591 = vmatpush1.bf16.msra.mxu0 %v886_v49 }
  0x42   : > { %592 = vmatprep.subr.bf16.mxu0 %v901_v1 }
  0x45   : > { %593 = vmatpush1.bf16.msra.mxu0 %v887_v50 }
  0x46   : > { %594 = vmatprep.subr.bf16.mxu0 %v901_v1 }
  0x49   : > { %595 = vmatpush1.bf16.msra.mxu0 %v888_v51 }
  0x4a   : > { %596 = vmatprep.subr.bf16.mxu0 %v901_v1 }
  0x4d   : > { %597 = vmatpush1.bf16.msra.mxu0 %v889_v52 }
  0x4e   : > { %612 = vmatprep.subr.bf16.mxu0 %v901_v1 }
  0x51   : > { %613 = vmatpush2.bf16.msra.mxu0 %v890_v54 }
  0x54   : > { %615 = vmatmul.mubr.bf16.vlgmr.msra.gmra.mxu0 %v520_v57 }
  0xf0   : > { %v387_v58 = vpop.f32.mrf.mxu0  ;;  %v485_v59 = vpop.f32.mrf.mxu1 }
  0xf1   : > { %v486_v4 = vadd.f32 %v485_v59, %v387_v58 }
  0xf2   : > { %v389_v60 = vpop.f32.mrf.mxu0  ;;  %v487_v61 = vpop.f32.mrf.mxu1 }
  0xf4   : > { %v390_v62 = vpop.f32.mrf.mxu0  ;;  %v488_v63 = vpop.f32.mrf.mxu1 }
  0xf5   : > { %v489_v6 = vadd.f32 %v488_v63, %v390_v62 }
  0xf6   : > { %v392_v0 = vpop.f32.mrf.mxu0  ;;  %v490_v2 = vpop.f32.mrf.mxu1 }
 0x114   : > { %v616_v3 = vpop.f32.mrf.mxu0 }
 0x115   : > { %v623_v7 = vadd.f32 %v616_v3, %v486_v4 }
 0x116   : > { %v618_v5 = vpop.f32.mrf.mxu0 }
 0x117   : > { %v643_v10 = vmul.f32 %v623_v7, %v623_v7 }
 0x118   : > { %v619_v1 = vpop.f32.mrf.mxu0 }
 0x119   : > { %v624_v8 = vadd.f32 %v619_v1, %v489_v6 }
 0x11a   : > { %v621_v9 = vpop.f32.mrf.mxu0 }
 0x11b   : > { %v848_v11 = vpack.c.bf16 %v624_v8, %v623_v7  ;;  %v635_v12 = vadd.f32 %v624_v8, %v623_v7  ;;  %v644_v13 = vmul.f32 %v624_v8, %v624_v8 }
 0x11d   : > { %849 = vst [vmem:[%s208_s30] sm:$0xff] %v848_v11   ;;  %v636_v14 = vrot.slane %v635_v12, 4  ;;  %v645_v15 = vadd.f32 %v644_v13, %v643_v10 }
 0x11f   : > { %v637_v16 = vadd.f32 %v636_v14, %v635_v12  ;;  %v646_v17 = vrot.slane %v645_v15, 4 }
 0x121   : > { %v638_v18 = vrot.slane %v637_v16, 2  ;;  %v647_v19 = vadd.f32 %v646_v17, %v645_v15 }
 0x123   : > { %v639_v20 = vadd.f32 %v638_v18, %v637_v16  ;;  %v648_v21 = vrot.slane %v647_v19, 2 }
 0x125   : > { %v640_v22 = vrot.slane %v639_v20, 1  ;;  %v649_v23 = vadd.f32 %v648_v21, %v647_v19 }
 0x127   : > { %v641_v24 = vadd.f32 %v640_v22, %v639_v20  ;;  %v650_v25 = vrot.slane %v649_v23, 1 }
 0x129   : > { %642 = vst [vmem:[%s211_s7] sm:$0x1] %v641_v24  ;;  %v651_v26 = vadd.f32 %v650_v25, %v649_v23 }
 0x12b   : > { %652 = vst [vmem:[%s214_s10] sm:$0x1] %v651_v26 }
 0x12c PF: > { %s15_s15 = sadd.s32 1, %s899_s15  }
 0x12d   : > { %p12_p4 = scmp.ge.s32.totalorder %s15_s15, 4  }
 0x12f   :  { %14 = sbr.rel (!%p12_p4) target bundleno = 1 (0x1), region = 84 }

// kernel: resnet_block_forward.8
= control target key start
LH: loop header
LB: loop body
LE: loop exit
PB: predicated region body
PF: predicated region fallthrough
CT: control target
= control target key end

     0   :  { %s528_s15 = smov 0   ;;  %s568_s0 = inlined_call_operand.vmem [shape: bf16[2,16,64], index: 0, kind: input, shape index: {}]   ;;  %s569_s1 = inlined_call_operand.vmem [shape: bf16[1,64,128], index: 1, kind: input, shape index: {}]   ;;  %s570_s2 = inlined_call_operand.vmem [shape: bf16[2,16,128], index: 2, kind: output, shape index: {0}]   ;;  %s571_s3 = inlined_call_operand.vmem [shape: f32[2,1,128], index: 3, kind: output, shape index: {1}]   ;;  %s572_s4 = inlined_call_operand.vmem [shape: f32[2,1,128], index: 4, kind: output, shape index: {2}]  }
   0x1 LB: > { %s433_s16 = sadd.s32 4294967295, %s499_s15   ;;  %p437_p0 = scmp.ge.s32.totalorder %s499_s15, 1  ;;  %s499_s15 = sphi %s528_s15, %s15_s15  }
   0x2   : > { %p167_p1 = scmp.lt.s32.totalorder %s499_s15, 3 }
   0x4   : > { %p168_p2 = pnand %p437_p0, %p167_p1 }
   0x5   : > { %p199_p3 = scmp.lt.s32.totalorder (!%p168_p2), %s433_s16, 1 }
   0x6   : > { %171 = sbr.rel (%p168_p2) target bundleno = 242 (0xf2), region = 28 }
   0xb   : > { %v488_v0 = vld [vmem:[%s569_s1 + $0x18] sm:$0xff]   ;;  %v501_v1 = vmov 0.0   ;;  %v489_v2 = vld [vmem:[%s569_s1 + $0x10] sm:$0xff]   ;;  %vm502_vm0 = vmmov 0   ;;  %s574_s16 = smov (!%p199_p3, %s433_s16), 1  ;;  %v490_v3 = vld [vmem:[%s569_s1 + $0x8] sm:$0xff]  }
   0xc   : > { %466 = vmatprep.subr.bf16.mxu0 %v501_v1  ;;  %474 = vmatprep.mubr.msk.bf16.mxu0 %vm502_vm0, %v501_v1  ;;  %s452_s23 = sshll.u32 %s574_s16, 3  ;;  %v491_v4 = vld [vmem:[%s569_s1] sm:$0xff]   ;;  %vm255_vm1 = vcmask 523264   ;;  %s211_s8 = scalar_lea.vmem %s571_s3, %s574_s16 }
   0xd   : > { %467 = vmatpush3.bf16.msra.mxu0 %v488_v0  ;;  %s203_s26 = scalar_lea.vmem %s568_s0, %s452_s23  ;;  %s208_s5 = scalar_lea.vmem %s570_s2, %s452_s23 }
   0xe   : > { %468 = vmatprep.subr.bf16.mxu0 %v501_v1  ;;  %v492_v5 = vld [vmem:[%s203_s26] sm:$0xff]   ;;  %s214_s11 = scalar_lea.vmem %s572_s4, %s574_s16 }
  0x11   : > { %469 = vmatpush3.bf16.msra.mxu0 %v489_v2 }
  0x12   : > { %470 = vmatprep.subr.bf16.mxu0 %v501_v1 }
  0x15   : > { %471 = vmatpush3.bf16.msra.mxu0 %v490_v3 }
  0x16   : > { %472 = vmatprep.subr.bf16.mxu0 %v501_v1 }
  0x19   : > { %473 = vmatpush3.bf16.msra.mxu0 %v491_v4 }
  0x1c   : > { %475 = vmatmul.mubr.msk.bf16.vlgmr.msra.gmra.mxu0 %vm255_vm1, %v492_v5 }
  0xdc   : > { %v293_v6 = vpop.f32.mrf.mxu0 }
  0xdd   : > { %v318_v9 = vmul.f32 %v293_v6, %v293_v6 }
  0xde   : > { %v476_v7 = vpop.f32.mrf.mxu0 }
  0xe0   : > { %v296_v8 = vpop.f32.mrf.mxu0 }
  0xe1   : > { %v459_v10 = vpack.c.bf16 %v296_v8, %v293_v6  ;;  %v310_v11 = vadd.f32 %v296_v8, %v293_v6  ;;  %v319_v12 = vmul.f32 %v296_v8, %v296_v8 }
  0xe2   : > { %v477_v13 = vpop.f32.mrf.mxu0 }
  0xe3   : > { %460 = vst [vmem:[%s208_s5] sm:$0xff] %v459_v10   ;;  %v311_v14 = vrot.slane %v310_v11, 4  ;;  %v320_v15 = vadd.f32 %v319_v12, %v318_v9 }
  0xe5   : > { %v312_v16 = vadd.f32 %v311_v14, %v310_v11  ;;  %v321_v17 = vrot.slane %v320_v15, 4 }
  0xe7   : > { %v313_v18 = vrot.slane %v312_v16, 2  ;;  %v322_v19 = vadd.f32 %v321_v17, %v320_v15 }
  0xe9   : > { %v314_v20 = vadd.f32 %v313_v18, %v312_v16  ;;  %v323_v21 = vrot.slane %v322_v19, 2 }
  0xeb   : > { %v315_v22 = vrot.slane %v314_v20, 1  ;;  %v324_v23 = vadd.f32 %v323_v21, %v322_v19 }
  0xed   : > { %v316_v24 = vadd.f32 %v315_v22, %v314_v20  ;;  %v325_v25 = vrot.slane %v324_v23, 1 }
  0xef   : > { %317 = vst [vmem:[%s211_s8] sm:$0x1] %v316_v24  ;;  %v326_v26 = vadd.f32 %v325_v25, %v324_v23 }
  0xf1   : > { %327 = vst [vmem:[%s214_s11] sm:$0x1] %v326_v26 }
  0xf2 PF: > { %s15_s15 = sadd.s32 1, %s499_s15  }
  0xf3   : > { %p12_p4 = scmp.ge.s32.totalorder %s15_s15, 4  }
  0xf5   :  { %14 = sbr.rel (!%p12_p4) target bundleno = 1 (0x1), region = 82 }

</bundles_post_ra>
